<compile_context>
chip_gen: v7x
topology: tpu7x:2x2x1
jax: 0.10.0
libtpu: 0.0.40
codegen_flags: <defaults>
</compile_context>

<pallas_src>
import jax
import jax.numpy as jnp
from jax.experimental import pallas as pl
from jax.experimental.pallas import tpu as pltpu

HIDDEN_UNITS = 50
BN_EPS = 0.8
LRELU_SLOPE = 0.2
LAYER_DIMS = [HIDDEN_UNITS, 64, 128, 256, 512, 784]  # 5 Linear layers
OUT_DIM = LAYER_DIMS[-1]                              # 784
OUT_PAD = 896                                         # 7 * 128, lane-dense output


def generator_kernel(
    x_ref,
    w1_ref, g1_ref, be1_ref,
    w2_ref, g2_ref, be2_ref,
    w3_ref, g3_ref, be3_ref,
    w4_ref, g4_ref, be4_ref,
    w5_ref, b5_ref,
    o_ref,
):
    h = x_ref[...]  # f32 activations

    def block(h, w_ref, g_ref, be_ref):
        # bf16 MXU matmul, f32 accumulation. Linear bias is omitted: it is
        # exactly cancelled by the BatchNorm mean subtraction below.
        h = jnp.dot(h.astype(jnp.bfloat16), w_ref[...],
                    preferred_element_type=jnp.float32)
        h = jnp.where(h > 0, h, LRELU_SLOPE * h)  # LeakyReLU(0.2), f32 VPU
        # Training-mode BatchNorm1d fused into one affine:
        #   scale = gamma * rsqrt(var + eps); shift = beta - mean * scale
        mean = jnp.mean(h, axis=0, keepdims=True)
        mean_sq = jnp.mean(h * h, axis=0, keepdims=True)
        var = mean_sq - mean * mean            # biased batch variance
        scale = g_ref[...] * jax.lax.rsqrt(var + BN_EPS)
        shift = be_ref[...] - mean * scale
        return h * scale + shift

    h = block(h, w1_ref, g1_ref, be1_ref)
    h = block(h, w2_ref, g2_ref, be2_ref)
    h = block(h, w3_ref, g3_ref, be3_ref)
    h = block(h, w4_ref, g4_ref, be4_ref)

    # Final Linear (padded to 896 output columns, zero pad cols) + Tanh.
    h = jnp.dot(h.astype(jnp.bfloat16), w5_ref[...],
                preferred_element_type=jnp.float32) + b5_ref[...]
    o_ref[...] = jnp.tanh(h)


def init_params(key):
    """Deterministic parameter init matching PyTorch Linear/BatchNorm shapes.

    Linear weights stored transposed as (in, out) in bf16 (MXU inputs). Biases
    for layers 1-4 are not materialized (cancelled by the following BatchNorm).
    The final layer's weight/bias are zero-padded to 896 output columns so the
    kernel writes a lane-dense output.
    """
    params = []
    keys = jax.random.split(key, len(LAYER_DIMS) - 1)
    for li in range(len(LAYER_DIMS) - 1):
        fan_in, fan_out = LAYER_DIMS[li], LAYER_DIMS[li + 1]
        kw, kb = jax.random.split(keys[li])
        bound = 1.0 / (fan_in ** 0.5)
        w = jax.random.uniform(kw, (fan_in, fan_out), jnp.float32, -bound, bound)
        if li < len(LAYER_DIMS) - 2:
            # Linear (bias dropped — cancelled by BN) + BatchNorm gamma/beta.
            params += [
                w.astype(jnp.bfloat16),
                jnp.ones((1, fan_out), jnp.float32),   # gamma
                jnp.zeros((1, fan_out), jnp.float32),  # beta
            ]
        else:
            b = jax.random.uniform(kb, (1, fan_out), jnp.float32, -bound, bound)
            w_pad = jnp.zeros((fan_in, OUT_PAD), jnp.float32).at[:, :fan_out].set(w)
            b_pad = jnp.zeros((1, OUT_PAD), jnp.float32).at[:, :fan_out].set(b)
            params += [w_pad.astype(jnp.bfloat16), b_pad]
    return params


def generator_forward(x, params):
    B = x.shape[0]
    n_inputs = 1 + len(params)
    vmem_spec = pl.BlockSpec(memory_space=pltpu.MemorySpace.VMEM)

    # Cost estimate for the XLA scheduler.
    matmul_dims = [(50, 64), (64, 128), (128, 256), (256, 512), (512, OUT_PAD)]
    flops = 2 * B * sum(m * n for m, n in matmul_dims)
    weight_bytes = 2 * sum(m * n for m, n in matmul_dims)               # bf16
    small_param_bytes = 4 * (2 * (64 + 128 + 256 + 512) + OUT_PAD)      # f32
    bytes_accessed = (weight_bytes + small_param_bytes
                      + 4 * B * HIDDEN_UNITS + 4 * B * OUT_PAD)
    transcendentals = B * OUT_PAD  # tanh

    # Whole batch stays VMEM-resident (training-mode BN needs full-batch stats).
    # Budget: params + live activations (double-buffered margin), capped at
    # 48 MiB so it also fits v7x's 64 MiB per-core physical VMEM.
    act_bytes = 4 * B * (HIDDEN_UNITS + 64 + 128 + 256 + 512 + 2 * OUT_PAD)
    needed = 2 * (weight_bytes + small_param_bytes + act_bytes) + (4 << 20)
    vmem_limit = int(min(max(needed, 16 << 20), 48 << 20))

    flat = pl.pallas_call(
        generator_kernel,
        out_shape=jax.ShapeDtypeStruct((B, OUT_PAD), jnp.float32),
        in_specs=[vmem_spec] * n_inputs,
        out_specs=vmem_spec,
        compiler_params=pltpu.CompilerParams(vmem_limit_bytes=vmem_limit),
        cost_estimate=pl.CostEstimate(
            flops=flops,
            transcendentals=transcendentals,
            bytes_accessed=bytes_accessed,
        ),
    )(x, *params)

    # Slice away the lane padding, then match PyTorch's reshape(1, -1, 28, 28).
    return flat[:, :OUT_DIM].reshape(1, -1, 28, 28)


if __name__ == "__main__":
    key = jax.random.PRNGKey(0)
    k_x, k_p = jax.random.split(key)

    batch = 8
    x = jax.random.normal(k_x, (batch, HIDDEN_UNITS), jnp.float32)
    params = init_params(k_p)

    out = generator_forward(x, params)
    out = jax.block_until_ready(out)

    assert out.shape == (1, batch, 28, 28), out.shape
    assert out.dtype == jnp.float32
    assert bool(jnp.all(jnp.isfinite(out)))
    assert bool(jnp.all(jnp.abs(out) <= 1.0))  # tanh range

    print("KERNEL_OK")
</pallas_src>

<mosaic_0001>
module attributes {stable_mosaic.version = 11 : i64} {
  func.func @generator_kernel(%arg0: memref<8x50xf32, #tpu.memory_space<vmem>>, %arg1: memref<50x64xbf16, #tpu.memory_space<vmem>>, %arg2: memref<1x64xf32, #tpu.memory_space<vmem>>, %arg3: memref<1x64xf32, #tpu.memory_space<vmem>>, %arg4: memref<64x128xbf16, #tpu.memory_space<vmem>>, %arg5: memref<1x128xf32, #tpu.memory_space<vmem>>, %arg6: memref<1x128xf32, #tpu.memory_space<vmem>>, %arg7: memref<128x256xbf16, #tpu.memory_space<vmem>>, %arg8: memref<1x256xf32, #tpu.memory_space<vmem>>, %arg9: memref<1x256xf32, #tpu.memory_space<vmem>>, %arg10: memref<256x512xbf16, #tpu.memory_space<vmem>>, %arg11: memref<1x512xf32, #tpu.memory_space<vmem>>, %arg12: memref<1x512xf32, #tpu.memory_space<vmem>>, %arg13: memref<512x896xbf16, #tpu.memory_space<vmem>>, %arg14: memref<1x896xf32, #tpu.memory_space<vmem>>, %arg15: memref<8x896xf32, #tpu.memory_space<vmem>>) attributes {dimension_semantics = [], scalar_prefetch = 0 : i64, scratch_operands = 0 : i64, tpu.core_type = #tpu.core_type<tc>} {
    %c0 = arith.constant 0 : index
    %c0_0 = arith.constant 0 : index
    %0 = vector.load %arg0[%c0, %c0_0] : memref<8x50xf32, #tpu.memory_space<vmem>>, vector<8x50xf32>
    %1 = arith.truncf %0 : vector<8x50xf32> to vector<8x50xbf16>
    %c0_1 = arith.constant 0 : index
    %c0_2 = arith.constant 0 : index
    %2 = vector.load %arg1[%c0_1, %c0_2] : memref<50x64xbf16, #tpu.memory_space<vmem>>, vector<50x64xbf16>
    %cst = arith.constant dense<0.000000e+00> : vector<8x64xf32>
    %3 = tpu.matmul %1, %2, %cst {dimension_numbers = #tpu.dot_dimension_numbers<[1], [0], [0], [1], [0, 0, 1, 1], [], []>} : vector<8x50xbf16>, vector<50x64xbf16>, vector<8x64xf32> -> vector<8x64xf32>
    %cst_3 = arith.constant 0.000000e+00 : f32
    %4 = vector.broadcast %cst_3 : f32 to vector<8x64xf32>
    %5 = arith.cmpf ogt, %3, %4 : vector<8x64xf32>
    %cst_4 = arith.constant 2.000000e-01 : f32
    %6 = vector.broadcast %cst_4 : f32 to vector<8x64xf32>
    %7 = arith.mulf %6, %3 : vector<8x64xf32>
    %8 = arith.select %5, %3, %7 : vector<8x64xi1>, vector<8x64xf32>
    %cst_5 = arith.constant dense<0.000000e+00> : vector<64xf32>
    %9 = vector.multi_reduction <add>, %8, %cst_5 [0] : vector<8x64xf32> to vector<64xf32>
    %10 = vector.shape_cast %9 : vector<64xf32> to vector<1x64xf32>
    %cst_6 = arith.constant 8.000000e+00 : f32
    %11 = vector.broadcast %cst_6 : f32 to vector<1x64xf32>
    %12 = arith.divf %10, %11 : vector<1x64xf32>
    %13 = arith.mulf %8, %8 : vector<8x64xf32>
    %cst_7 = arith.constant dense<0.000000e+00> : vector<64xf32>
    %14 = vector.multi_reduction <add>, %13, %cst_7 [0] : vector<8x64xf32> to vector<64xf32>
    %15 = vector.shape_cast %14 : vector<64xf32> to vector<1x64xf32>
    %cst_8 = arith.constant 8.000000e+00 : f32
    %16 = vector.broadcast %cst_8 : f32 to vector<1x64xf32>
    %17 = arith.divf %15, %16 : vector<1x64xf32>
    %18 = arith.mulf %12, %12 : vector<1x64xf32>
    %19 = arith.subf %17, %18 : vector<1x64xf32>
    %c0_9 = arith.constant 0 : index
    %c0_10 = arith.constant 0 : index
    %20 = vector.load %arg2[%c0_9, %c0_10] : memref<1x64xf32, #tpu.memory_space<vmem>>, vector<1x64xf32>
    %cst_11 = arith.constant 8.000000e-01 : f32
    %21 = vector.broadcast %cst_11 : f32 to vector<1x64xf32>
    %22 = arith.addf %19, %21 : vector<1x64xf32>
    %23 = math.rsqrt %22 : vector<1x64xf32>
    %24 = arith.mulf %20, %23 : vector<1x64xf32>
    %c0_12 = arith.constant 0 : index
    %c0_13 = arith.constant 0 : index
    %25 = vector.load %arg3[%c0_12, %c0_13] : memref<1x64xf32, #tpu.memory_space<vmem>>, vector<1x64xf32>
    %26 = arith.mulf %12, %24 : vector<1x64xf32>
    %27 = arith.subf %25, %26 : vector<1x64xf32>
    %28 = vector.broadcast %24 : vector<1x64xf32> to vector<8x64xf32>
    %29 = arith.mulf %8, %28 : vector<8x64xf32>
    %30 = vector.broadcast %27 : vector<1x64xf32> to vector<8x64xf32>
    %31 = arith.addf %29, %30 : vector<8x64xf32>
    %32 = arith.truncf %31 : vector<8x64xf32> to vector<8x64xbf16>
    %c0_14 = arith.constant 0 : index
    %c0_15 = arith.constant 0 : index
    %33 = vector.load %arg4[%c0_14, %c0_15] : memref<64x128xbf16, #tpu.memory_space<vmem>>, vector<64x128xbf16>
    %cst_16 = arith.constant dense<0.000000e+00> : vector<8x128xf32>
    %34 = tpu.matmul %32, %33, %cst_16 {dimension_numbers = #tpu.dot_dimension_numbers<[1], [0], [0], [1], [0, 0, 1, 1], [], []>} : vector<8x64xbf16>, vector<64x128xbf16>, vector<8x128xf32> -> vector<8x128xf32>
    %cst_17 = arith.constant 0.000000e+00 : f32
    %35 = vector.broadcast %cst_17 : f32 to vector<8x128xf32>
    %36 = arith.cmpf ogt, %34, %35 : vector<8x128xf32>
    %cst_18 = arith.constant 2.000000e-01 : f32
    %37 = vector.broadcast %cst_18 : f32 to vector<8x128xf32>
    %38 = arith.mulf %37, %34 : vector<8x128xf32>
    %39 = arith.select %36, %34, %38 : vector<8x128xi1>, vector<8x128xf32>
    %cst_19 = arith.constant dense<0.000000e+00> : vector<128xf32>
    %40 = vector.multi_reduction <add>, %39, %cst_19 [0] : vector<8x128xf32> to vector<128xf32>
    %41 = vector.shape_cast %40 : vector<128xf32> to vector<1x128xf32>
    %cst_20 = arith.constant 8.000000e+00 : f32
    %42 = vector.broadcast %cst_20 : f32 to vector<1x128xf32>
    %43 = arith.divf %41, %42 : vector<1x128xf32>
    %44 = arith.mulf %39, %39 : vector<8x128xf32>
    %cst_21 = arith.constant dense<0.000000e+00> : vector<128xf32>
    %45 = vector.multi_reduction <add>, %44, %cst_21 [0] : vector<8x128xf32> to vector<128xf32>
    %46 = vector.shape_cast %45 : vector<128xf32> to vector<1x128xf32>
    %cst_22 = arith.constant 8.000000e+00 : f32
    %47 = vector.broadcast %cst_22 : f32 to vector<1x128xf32>
    %48 = arith.divf %46, %47 : vector<1x128xf32>
    %49 = arith.mulf %43, %43 : vector<1x128xf32>
    %50 = arith.subf %48, %49 : vector<1x128xf32>
    %c0_23 = arith.constant 0 : index
    %c0_24 = arith.constant 0 : index
    %51 = vector.load %arg5[%c0_23, %c0_24] : memref<1x128xf32, #tpu.memory_space<vmem>>, vector<1x128xf32>
    %cst_25 = arith.constant 8.000000e-01 : f32
    %52 = vector.broadcast %cst_25 : f32 to vector<1x128xf32>
    %53 = arith.addf %50, %52 : vector<1x128xf32>
    %54 = math.rsqrt %53 : vector<1x128xf32>
    %55 = arith.mulf %51, %54 : vector<1x128xf32>
    %c0_26 = arith.constant 0 : index
    %c0_27 = arith.constant 0 : index
    %56 = vector.load %arg6[%c0_26, %c0_27] : memref<1x128xf32, #tpu.memory_space<vmem>>, vector<1x128xf32>
    %57 = arith.mulf %43, %55 : vector<1x128xf32>
    %58 = arith.subf %56, %57 : vector<1x128xf32>
    %59 = vector.broadcast %55 : vector<1x128xf32> to vector<8x128xf32>
    %60 = arith.mulf %39, %59 : vector<8x128xf32>
    %61 = vector.broadcast %58 : vector<1x128xf32> to vector<8x128xf32>
    %62 = arith.addf %60, %61 : vector<8x128xf32>
    %63 = arith.truncf %62 : vector<8x128xf32> to vector<8x128xbf16>
    %c0_28 = arith.constant 0 : index
    %c0_29 = arith.constant 0 : index
    %64 = vector.load %arg7[%c0_28, %c0_29] : memref<128x256xbf16, #tpu.memory_space<vmem>>, vector<128x256xbf16>
    %cst_30 = arith.constant dense<0.000000e+00> : vector<8x256xf32>
    %65 = tpu.matmul %63, %64, %cst_30 {dimension_numbers = #tpu.dot_dimension_numbers<[1], [0], [0], [1], [0, 0, 1, 1], [], []>} : vector<8x128xbf16>, vector<128x256xbf16>, vector<8x256xf32> -> vector<8x256xf32>
    %cst_31 = arith.constant 0.000000e+00 : f32
    %66 = vector.broadcast %cst_31 : f32 to vector<8x256xf32>
    %67 = arith.cmpf ogt, %65, %66 : vector<8x256xf32>
    %cst_32 = arith.constant 2.000000e-01 : f32
    %68 = vector.broadcast %cst_32 : f32 to vector<8x256xf32>
    %69 = arith.mulf %68, %65 : vector<8x256xf32>
    %70 = arith.select %67, %65, %69 : vector<8x256xi1>, vector<8x256xf32>
    %cst_33 = arith.constant dense<0.000000e+00> : vector<256xf32>
    %71 = vector.multi_reduction <add>, %70, %cst_33 [0] : vector<8x256xf32> to vector<256xf32>
    %72 = vector.shape_cast %71 : vector<256xf32> to vector<1x256xf32>
    %cst_34 = arith.constant 8.000000e+00 : f32
    %73 = vector.broadcast %cst_34 : f32 to vector<1x256xf32>
    %74 = arith.divf %72, %73 : vector<1x256xf32>
    %75 = arith.mulf %70, %70 : vector<8x256xf32>
    %cst_35 = arith.constant dense<0.000000e+00> : vector<256xf32>
    %76 = vector.multi_reduction <add>, %75, %cst_35 [0] : vector<8x256xf32> to vector<256xf32>
    %77 = vector.shape_cast %76 : vector<256xf32> to vector<1x256xf32>
    %cst_36 = arith.constant 8.000000e+00 : f32
    %78 = vector.broadcast %cst_36 : f32 to vector<1x256xf32>
    %79 = arith.divf %77, %78 : vector<1x256xf32>
    %80 = arith.mulf %74, %74 : vector<1x256xf32>
    %81 = arith.subf %79, %80 : vector<1x256xf32>
    %c0_37 = arith.constant 0 : index
    %c0_38 = arith.constant 0 : index
    %82 = vector.load %arg8[%c0_37, %c0_38] : memref<1x256xf32, #tpu.memory_space<vmem>>, vector<1x256xf32>
    %cst_39 = arith.constant 8.000000e-01 : f32
    %83 = vector.broadcast %cst_39 : f32 to vector<1x256xf32>
    %84 = arith.addf %81, %83 : vector<1x256xf32>
    %85 = math.rsqrt %84 : vector<1x256xf32>
    %86 = arith.mulf %82, %85 : vector<1x256xf32>
    %c0_40 = arith.constant 0 : index
    %c0_41 = arith.constant 0 : index
    %87 = vector.load %arg9[%c0_40, %c0_41] : memref<1x256xf32, #tpu.memory_space<vmem>>, vector<1x256xf32>
    %88 = arith.mulf %74, %86 : vector<1x256xf32>
    %89 = arith.subf %87, %88 : vector<1x256xf32>
    %90 = vector.broadcast %86 : vector<1x256xf32> to vector<8x256xf32>
    %91 = arith.mulf %70, %90 : vector<8x256xf32>
    %92 = vector.broadcast %89 : vector<1x256xf32> to vector<8x256xf32>
    %93 = arith.addf %91, %92 : vector<8x256xf32>
    %94 = arith.truncf %93 : vector<8x256xf32> to vector<8x256xbf16>
    %c0_42 = arith.constant 0 : index
    %c0_43 = arith.constant 0 : index
    %95 = vector.load %arg10[%c0_42, %c0_43] : memref<256x512xbf16, #tpu.memory_space<vmem>>, vector<256x512xbf16>
    %cst_44 = arith.constant dense<0.000000e+00> : vector<8x512xf32>
    %96 = tpu.matmul %94, %95, %cst_44 {dimension_numbers = #tpu.dot_dimension_numbers<[1], [0], [0], [1], [0, 0, 1, 1], [], []>} : vector<8x256xbf16>, vector<256x512xbf16>, vector<8x512xf32> -> vector<8x512xf32>
    %cst_45 = arith.constant 0.000000e+00 : f32
    %97 = vector.broadcast %cst_45 : f32 to vector<8x512xf32>
    %98 = arith.cmpf ogt, %96, %97 : vector<8x512xf32>
    %cst_46 = arith.constant 2.000000e-01 : f32
    %99 = vector.broadcast %cst_46 : f32 to vector<8x512xf32>
    %100 = arith.mulf %99, %96 : vector<8x512xf32>
    %101 = arith.select %98, %96, %100 : vector<8x512xi1>, vector<8x512xf32>
    %cst_47 = arith.constant dense<0.000000e+00> : vector<512xf32>
    %102 = vector.multi_reduction <add>, %101, %cst_47 [0] : vector<8x512xf32> to vector<512xf32>
    %103 = vector.shape_cast %102 : vector<512xf32> to vector<1x512xf32>
    %cst_48 = arith.constant 8.000000e+00 : f32
    %104 = vector.broadcast %cst_48 : f32 to vector<1x512xf32>
    %105 = arith.divf %103, %104 : vector<1x512xf32>
    %106 = arith.mulf %101, %101 : vector<8x512xf32>
    %cst_49 = arith.constant dense<0.000000e+00> : vector<512xf32>
    %107 = vector.multi_reduction <add>, %106, %cst_49 [0] : vector<8x512xf32> to vector<512xf32>
    %108 = vector.shape_cast %107 : vector<512xf32> to vector<1x512xf32>
    %cst_50 = arith.constant 8.000000e+00 : f32
    %109 = vector.broadcast %cst_50 : f32 to vector<1x512xf32>
    %110 = arith.divf %108, %109 : vector<1x512xf32>
    %111 = arith.mulf %105, %105 : vector<1x512xf32>
    %112 = arith.subf %110, %111 : vector<1x512xf32>
    %c0_51 = arith.constant 0 : index
    %c0_52 = arith.constant 0 : index
    %113 = vector.load %arg11[%c0_51, %c0_52] : memref<1x512xf32, #tpu.memory_space<vmem>>, vector<1x512xf32>
    %cst_53 = arith.constant 8.000000e-01 : f32
    %114 = vector.broadcast %cst_53 : f32 to vector<1x512xf32>
    %115 = arith.addf %112, %114 : vector<1x512xf32>
    %116 = math.rsqrt %115 : vector<1x512xf32>
    %117 = arith.mulf %113, %116 : vector<1x512xf32>
    %c0_54 = arith.constant 0 : index
    %c0_55 = arith.constant 0 : index
    %118 = vector.load %arg12[%c0_54, %c0_55] : memref<1x512xf32, #tpu.memory_space<vmem>>, vector<1x512xf32>
    %119 = arith.mulf %105, %117 : vector<1x512xf32>
    %120 = arith.subf %118, %119 : vector<1x512xf32>
    %121 = vector.broadcast %117 : vector<1x512xf32> to vector<8x512xf32>
    %122 = arith.mulf %101, %121 : vector<8x512xf32>
    %123 = vector.broadcast %120 : vector<1x512xf32> to vector<8x512xf32>
    %124 = arith.addf %122, %123 : vector<8x512xf32>
    %125 = arith.truncf %124 : vector<8x512xf32> to vector<8x512xbf16>
    %c0_56 = arith.constant 0 : index
    %c0_57 = arith.constant 0 : index
    %126 = vector.load %arg13[%c0_56, %c0_57] : memref<512x896xbf16, #tpu.memory_space<vmem>>, vector<512x896xbf16>
    %cst_58 = arith.constant dense<0.000000e+00> : vector<8x896xf32>
    %127 = tpu.matmul %125, %126, %cst_58 {dimension_numbers = #tpu.dot_dimension_numbers<[1], [0], [0], [1], [0, 0, 1, 1], [], []>} : vector<8x512xbf16>, vector<512x896xbf16>, vector<8x896xf32> -> vector<8x896xf32>
    %c0_59 = arith.constant 0 : index
    %c0_60 = arith.constant 0 : index
    %128 = vector.load %arg14[%c0_59, %c0_60] : memref<1x896xf32, #tpu.memory_space<vmem>>, vector<1x896xf32>
    %129 = vector.broadcast %128 : vector<1x896xf32> to vector<8x896xf32>
    %130 = arith.addf %127, %129 : vector<8x896xf32>
    %131 = math.tanh %130 : vector<8x896xf32>
    %c0_61 = arith.constant 0 : index
    %c0_62 = arith.constant 0 : index
    %132 = vector.load %arg15[%c0_61, %c0_62] : memref<8x896xf32, #tpu.memory_space<vmem>>, vector<8x896xf32>
    tpu.vector_store %arg15[%c0_61, %c0_62], %131 {strides = array<i32>} : memref<8x896xf32, #tpu.memory_space<vmem>>, vector<8x896xf32>,
    return
  }
}

</mosaic_0001>

<bundles_post_ra>
// kernel: tpu_custom_call.1
= control target key start
LH: loop header
LB: loop body
LE: loop exit
PB: predicated region body
PF: predicated region fallthrough
CT: control target
= control target key end

     0   :  { %s4591_s0 = inlined_call_operand.hbm [shape: f32[8,50], index: 0, kind: input, shape index: {}]   ;;  %s4592_s1 = inlined_call_operand.hbm [shape: bf16[50,64], index: 1, kind: input, shape index: {}]   ;;  %s4593_s2 = inlined_call_operand.hbm [shape: f32[1,64], index: 2, kind: input, shape index: {}]   ;;  %s4594_s3 = inlined_call_operand.hbm [shape: f32[1,64], index: 3, kind: input, shape index: {}]   ;;  %s4595_s4 = inlined_call_operand.hbm [shape: bf16[64,128], index: 4, kind: input, shape index: {}]   ;;  %s4596_s5 = inlined_call_operand.vmem [shape: f32[1,128], index: 5, kind: input, shape index: {}]   ;;  %s4597_s6 = inlined_call_operand.vmem [shape: f32[1,128], index: 6, kind: input, shape index: {}]   ;;  %s4598_s7 = inlined_call_operand.hbm [shape: bf16[128,256], index: 7, kind: input, shape index: {}]   ;;  %s4599_s8 = inlined_call_operand.vmem [shape: f32[1,256], index: 8, kind: input, shape index: {}]   ;;  %s4600_s9 = inlined_call_operand.vmem [shape: f32[1,256], index: 9, kind: input, shape index: {}]   ;;  %s4601_s10 = inlined_call_operand.hbm [shape: bf16[256,512], index: 10, kind: input, shape index: {}]   ;;  %s4602_s11 = inlined_call_operand.vmem [shape: f32[1,512], index: 11, kind: input, shape index: {}]   ;;  %s4603_s12 = inlined_call_operand.vmem [shape: f32[1,512], index: 12, kind: input, shape index: {}]   ;;  %s4604_s13 = inlined_call_operand.hbm [shape: bf16[512,896], index: 13, kind: input, shape index: {}]   ;;  %s4605_s14 = inlined_call_operand.vmem [shape: f32[1,896], index: 14, kind: input, shape index: {}]   ;;  %s4606_s15 = inlined_call_operand.hbm [shape: f32[8,896], index: 15, kind: output, shape index: {}]  }
   0x1   :  { %4608 = sst [smem:[#allocation23_spill]] %s4606_s15 }
   0x2   :  { %20 = vsyncpa [#allocation3], 0 }
   0x3   :  { %21 = vsyncpa [#allocation6], 0 }
   0x4   :  { %22 = vsyncpa [#allocation9], 0 }
   0x5   :  { %23 = vsyncpa [#allocation12], 0 }
   0x6   :  { %24 = vsyncpa [#allocation15], 0 }
   0x7   :  { %25 = vsyncpa [#allocation4], 0  ;;  %s4244_s18 = smov [#allocation5]   ;;  %s4034_s22 = scalar_lea.hbm %s4592_s1, 448 }
   0x8   :  { %s41_s19 = sshll.u32 %s4244_s18, 4  ;;  %p4035_p0 = scmp.ne.s32.totalorder %s4592_s1, %s4034_s22  ;;  %s42_s19 = int_to_ptr.vmem [resolvable:$true] %s41_s19 }
   0x9   :  { %p4038_p1 = scmp.lt.u32.totalorder %s4034_s22, %s4592_s1 }
   0xb   :  { %p4040_p2 = pnand %p4038_p1, %p4035_p0 }
   0xd   :  { %4043 = shalt.err (!%p4040_p2)
}
   0xe   :  { %s4044_s27 = scalar_lea.vmem %s42_s19, 448  ;;  %p4049_p4 = scmp.lt.s32.totalorder %s42_s19, %s42_s19 }
   0xf   :  { %p4045_p3 = scmp.ne.s32.totalorder %s42_s19, %s4044_s27  ;;  %p4050_p5 = scmp.lt.s32.totalorder %s4044_s27, %s4044_s27 }
  0x11   :  { %p4051_p6 = por %p4050_p5, %p4049_p4 }
  0x13   :  { %p4052_p7 = pnand %p4051_p6, %p4045_p3 }
  0x15   :  { %4055 = shalt.err (!%p4052_p7)
}
  0x16   :  { %s4245_s28 = smov 64   ;;  %s4246_s29 = smov 4  }
  0x17   :  { %47 = dma.hbm_to_vmem [thread:$0]  %s4592_s1, 448, %s42_s19, [#allocation6], %s4245_s28, %s4245_s28, %s4246_s29  }
  0x18   :  { %s4247_s17 = smov [#allocation8]   ;;  %s4248_s20 = smov [#allocation11]  }
  0x19   :  { %s64_s18 = sshll.u32 %s4247_s17, 4  ;;  %s89_s21 = sshll.u32 %s4248_s20, 4  ;;  %s65_s18 = int_to_ptr.vmem [resolvable:$true] %s64_s18  ;;  %s90_s21 = int_to_ptr.vmem [resolvable:$true] %s89_s21 }
  0x1a   :  { %s4056_s24 = scalar_lea.hbm %s4594_s3, 16 }
  0x1b   :  { %p4057_p8 = scmp.ne.s32.totalorder %s4594_s3, %s4056_s24  ;;  %p4060_p9 = scmp.lt.u32.totalorder %s4056_s24, %s4594_s3 }
  0x1d   :  { %p4062_p10 = pnand %p4060_p9, %p4057_p8 }
  0x1f   :  { %4065 = shalt.err (!%p4062_p10)
}
  0x20   :  { %s4066_s1 = scalar_lea.vmem %s65_s18, 16  ;;  %s4070_s19 = scalar_lea.vmem %s65_s18, 32 }
  0x21   :  { %p4067_p11 = scmp.ne.s32.totalorder %s65_s18, %s4066_s1  ;;  %p4071_p12 = scmp.lt.s32.totalorder %s65_s18, %s65_s18 }
  0x22   :  { %p4072_p13 = scmp.lt.s32.totalorder %s4070_s19, %s4066_s1 }
  0x24   :  { %p4073_p0 = por %p4072_p13, %p4071_p12 }
  0x26   :  { %p4074_p1 = pnand %p4073_p0, %p4067_p11 }
  0x28   :  { %4077 = shalt.err (!%p4074_p1)
}
  0x29   :  { %67 = dma.hbm_to_vmem [thread:$0]  %s4594_s3, 16, %s65_s18, [#allocation9]  }
  0x2a   :  { %s4078_s15 = scalar_lea.hbm %s4598_s7, 2048 }
  0x2b   :  { %p4079_p2 = scmp.ne.s32.totalorder %s4598_s7, %s4078_s15  ;;  %p4082_p3 = scmp.lt.u32.totalorder %s4078_s15, %s4598_s7 }
  0x2d   :  { %p4084_p4 = pnand %p4082_p3, %p4079_p2 }
  0x2f   :  { %4087 = shalt.err (!%p4084_p4)
}
  0x30   :  { %s4088_s26 = scalar_lea.vmem %s90_s21, 2048  ;;  %p4093_p6 = scmp.lt.s32.totalorder %s90_s21, %s90_s21 }
  0x31   :  { %p4089_p5 = scmp.ne.s32.totalorder %s90_s21, %s4088_s26  ;;  %p4094_p7 = scmp.lt.s32.totalorder %s4088_s26, %s4088_s26 }
  0x33   :  { %p4095_p8 = por %p4094_p7, %p4093_p6 }
  0x35   :  { %p4096_p9 = pnand %p4095_p8, %p4089_p5 }
  0x37   :  { %4099 = shalt.err (!%p4096_p9)
}
  0x38   :  { %s4249_s3 = smov 128   ;;  %s4250_s18 = smov 8  }
  0x39   :  { %95 = dma.hbm_to_vmem [thread:$0]  %s4598_s7, 2048, %s90_s21, [#allocation12], %s4249_s3, %s4249_s3, %s4250_s18  }
  0x3a   :  { %s4251_s19 = smov [#allocation2]   ;;  %s4252_s16 = smov [#allocation7]  }
  0x3b   :  { %s32_s30 = sshll.u32 %s4251_s19, 4  ;;  %s54_s17 = sshll.u32 %s4252_s16, 4  ;;  %s33_s30 = int_to_ptr.vmem [resolvable:$true] %s32_s30  ;;  %s55_s17 = int_to_ptr.vmem [resolvable:$true] %s54_s17 }
  0x3c   :  { %s4100_s22 = scalar_lea.hbm %s4591_s0, 128 }
  0x3d   :  { %p4101_p10 = scmp.ne.s32.totalorder %s4591_s0, %s4100_s22  ;;  %p4104_p11 = scmp.lt.u32.totalorder %s4100_s22, %s4591_s0 }
  0x3f   :  { %p4106_p12 = pnand %p4104_p11, %p4101_p10 }
  0x41   :  { %4109 = shalt.err (!%p4106_p12)
}
  0x42   :  { %s4110_s7 = scalar_lea.vmem %s33_s30, 128  ;;  %p4115_p0 = scmp.lt.s32.totalorder %s33_s30, %s33_s30 }
  0x43   :  { %p4111_p13 = scmp.ne.s32.totalorder %s33_s30, %s4110_s7  ;;  %p4116_p1 = scmp.lt.s32.totalorder %s4110_s7, %s4110_s7 }
  0x45   :  { %p4117_p2 = por %p4116_p1, %p4115_p0 }
  0x47   :  { %p4118_p3 = pnand %p4117_p2, %p4111_p13 }
  0x49   :  { %4121 = shalt.err (!%p4118_p3)
}
  0x4a   :  { %35 = dma.hbm_to_vmem [thread:$0]  %s4591_s0, 128, %s33_s30, [#allocation3]  }
  0x4b   :  { %s4122_s1 = scalar_lea.hbm %s4593_s2, 16 }
  0x4c   :  { %p4123_p4 = scmp.ne.s32.totalorder %s4593_s2, %s4122_s1  ;;  %p4126_p5 = scmp.lt.u32.totalorder %s4122_s1, %s4593_s2 }
  0x4e   :  { %p4128_p6 = pnand %p4126_p5, %p4123_p4 }
  0x50   :  { %4131 = shalt.err (!%p4128_p6)
}
  0x51   :  { %s4132_s22 = scalar_lea.vmem %s55_s17, 16  ;;  %s4136_s23 = scalar_lea.vmem %s55_s17, 32 }
  0x52   :  { %p4133_p7 = scmp.ne.s32.totalorder %s55_s17, %s4132_s22  ;;  %p4137_p8 = scmp.lt.s32.totalorder %s55_s17, %s55_s17 }
  0x53   :  { %p4138_p9 = scmp.lt.s32.totalorder %s4136_s23, %s4132_s22 }
  0x55   :  { %p4139_p10 = por %p4138_p9, %p4137_p8 }
  0x57   :  { %p4140_p11 = pnand %p4139_p10, %p4133_p7 }
  0x59   :  { %4143 = shalt.err (!%p4140_p11)
}
  0x5a   :  { %57 = dma.hbm_to_vmem [thread:$0]  %s4593_s2, 16, %s55_s17, [#allocation6]  }
  0x5b   :  { %s4253_s24 = smov [#allocation10]   ;;  %s4254_s26 = smov [#allocation13]  }
  0x5c   :  { %s73_s25 = sshll.u32 %s4253_s24, 4  ;;  %s105_s7 = sshll.u32 %s4254_s26, 4  ;;  %s74_s25 = int_to_ptr.vmem [resolvable:$true] %s73_s25  ;;  %s106_s7 = int_to_ptr.vmem [resolvable:$true] %s105_s7 }
  0x5d   :  { %s4144_s18 = scalar_lea.hbm %s4595_s4, 512 }
  0x5e   :  { %p4145_p12 = scmp.ne.s32.totalorder %s4595_s4, %s4144_s18  ;;  %p4148_p13 = scmp.lt.u32.totalorder %s4144_s18, %s4595_s4 }
  0x60   :  { %p4150_p0 = pnand %p4148_p13, %p4145_p12 }
  0x62   :  { %4153 = shalt.err (!%p4150_p0)
}
  0x63   :  { %s4154_s2 = scalar_lea.vmem %s74_s25, 512  ;;  %p4159_p2 = scmp.lt.s32.totalorder %s74_s25, %s74_s25 }
  0x64   :  { %p4155_p1 = scmp.ne.s32.totalorder %s74_s25, %s4154_s2  ;;  %p4160_p3 = scmp.lt.s32.totalorder %s4154_s2, %s4154_s2 }
  0x66   :  { %p4161_p4 = por %p4160_p3, %p4159_p2 }
  0x68   :  { %p4162_p5 = pnand %p4161_p4, %p4155_p1 }
  0x6a   :  { %4165 = shalt.err (!%p4162_p5)
}
  0x6b   :  { %79 = dma.hbm_to_vmem [thread:$0]  %s4595_s4, 512, %s74_s25, [#allocation9], %s4245_s28, %s4245_s28, %s4246_s29  }
  0x6c   :  { %s4166_s23 = scalar_lea.hbm %s4601_s10, 8192 }
  0x6d   :  { %p4167_p6 = scmp.ne.s32.totalorder %s4601_s10, %s4166_s23  ;;  %p4170_p7 = scmp.lt.u32.totalorder %s4166_s23, %s4601_s10 }
  0x6f   :  { %p4172_p8 = pnand %p4170_p7, %p4167_p6 }
  0x71   :  { %4175 = shalt.err (!%p4172_p8)
}
  0x72   :  { %s4176_s21 = scalar_lea.vmem %s106_s7, 8192  ;;  %p4181_p10 = scmp.lt.s32.totalorder %s106_s7, %s106_s7 }
  0x73   :  { %p4177_p9 = scmp.ne.s32.totalorder %s106_s7, %s4176_s21  ;;  %p4182_p11 = scmp.lt.s32.totalorder %s4176_s21, %s4176_s21 }
  0x75   :  { %p4183_p12 = por %p4182_p11, %p4181_p10 }
  0x77   :  { %p4184_p13 = pnand %p4183_p12, %p4177_p9 }
  0x79   :  { %4187 = shalt.err (!%p4184_p13)
}
  0x7a   :  { %s4255_s4 = smov 256   ;;  %s4256_s28 = smov 16  }
  0x7b   :  { %111 = dma.hbm_to_vmem [thread:$0]  %s4601_s10, 8192, %s106_s7, [#allocation12], %s4255_s4, %s4255_s4, %s4256_s28  }
  0x7c   :  { %s4257_s3 = smov [#allocation14]   ;;  %s4188_s19 = scalar_lea.hbm %s4604_s13, 28672 }
  0x7d   :  { %s121_s18 = sshll.u32 %s4257_s3, 4  ;;  %p4189_p0 = scmp.ne.s32.totalorder %s4604_s13, %s4188_s19  ;;  %s122_s18 = int_to_ptr.vmem [resolvable:$true] %s121_s18 }
  0x7e   :  { %p4192_p1 = scmp.lt.u32.totalorder %s4188_s19, %s4604_s13 }
  0x80   :  { %p4194_p2 = pnand %p4192_p1, %p4189_p0 }
  0x82   :  { %4197 = shalt.err (!%p4194_p2)
}
  0x83   :  { %s4198_s15 = scalar_lea.vmem %s122_s18, 28672  ;;  %p4203_p4 = scmp.lt.s32.totalorder %s122_s18, %s122_s18 }
  0x84   :  { %p4199_p3 = scmp.ne.s32.totalorder %s122_s18, %s4198_s15  ;;  %p4204_p5 = scmp.lt.s32.totalorder %s4198_s15, %s4198_s15 }
  0x86   :  { %p4205_p6 = por %p4204_p5, %p4203_p4 }
  0x88   :  { %p4206_p7 = pnand %p4205_p6, %p4199_p3 }
  0x8a   :  { %4209 = shalt.err (!%p4206_p7)
}
  0x8b   :  { %s4258_s10 = smov 448   ;;  %s4259_s7 = smov 28  }
  0x8c   :  { %127 = dma.hbm_to_vmem [thread:$0]  %s4604_s13, 28672, %s122_s18, [#allocation15], %s4258_s10, %s4258_s10, %s4259_s7  }
  0x8d   :  { %4232 = dma.done.wait [#allocation3], 128  }
  0x8e   :  { %4233 = vsyncadd [#allocation3], 4294967168 }
  0x8f   :  { %4234 = dma.done.wait [#allocation6], 464  }
  0x90   :  { %4235 = vsyncadd [#allocation6], 4294966832 }
  0x91   :  { %4236 = dma.done.wait [#allocation9], 528  }
  0x92   :  { %4237 = vsyncadd [#allocation9], 4294966768 }
  0x93   :  { %4238 = dma.done.wait [#allocation12], 10240  }
  0x94   :  { %4239 = vsyncadd [#allocation12], 4294957056 }
  0x95   :  { %4240 = dma.done.wait [#allocation15], 28672  }
  0x96   :  { %4241 = vsyncadd [#allocation15], 4294938624  ;;  %v4260_v0 = vmov 0.0   ;;  %vm4261_vm0 = vmmov 0   ;;  %v3556_v1 = vld [vmem:[#allocation5] sm:$0xff]   ;;  %v3557_v2 = vld [vmem:[#allocation5 + $0x8] sm:$0xff]   ;;  %v265_v38 = vlaneseq }
  0x97   :  { %3493 = vmatprep.subr.bf16.mxu0 %v4260_v0  ;;  %3501 = vmatprep.mubr.msk.bf16.mxu0 %vm4261_vm0, %v4260_v0  ;;  %v3558_v3 = vld [vmem:[#allocation5 + $0x10] sm:$0xff]   ;;  %v3559_v4 = vld [vmem:[#allocation5 + $0x18] ss:$0 sps:$4 sm:$0x11]   ;;  %vm189_vm1 = vcmask 1040384   ;;  %vm185_vm2 = vcmask 408576  }
  0x98   :  { %3494 = vmatpush3.bf16.msra.mxu0 %v3556_v1  ;;  %v155_v5 = vld [vmem:[#allocation2] sm:$0xff]  ;;  %v191_v6 = vsel %vm189_vm1, %v3559_v4, 0  ;;  %v3560_v8 = vld [vmem:[#allocation10] sm:$0xff]   ;;  %v3561_v9 = vld [vmem:[#allocation10 + $0x8] sm:$0xff]   ;;  %vm236_vm4 = vcmask 523264   ;;  %v4451_v39 = vshrl.u32 %v265_v38, 7 }
  0x99   :  { %3495 = vmatprep.subr.bf16.mxu0 %v4260_v0  ;;  %v156_v7 = vpack.c.bf16 %v155_v5, %v155_v5  ;;  %v3562_v10 = vld [vmem:[#allocation10 + $0x10] sm:$0xff]   ;;  %v3563_v11 = vld [vmem:[#allocation10 + $0x18] sm:$0xff]   ;;  %v3566_v52 = vld [vmem:[#allocation11 + $0x4] ss:$8 sps:$4 sm:$0xff]   ;;  %v4262_v4 = vmov 0  }
  0x9a   :  { %v257_v40 = vld [vmem:[#allocation7] sm:$0x1]  ;;  %v4454_v41 = vsub.s32 0, %v4451_v39  ;;  %v261_v44 = vld [vmem:[#allocation8] sm:$0x1] }
  0x9b   :  { %v3564_v53 = vld [vmem:[#allocation11] ss:$8 sps:$4 sm:$0xff]   ;;  %v3569_v54 = vld [vmem:[#allocation11 + $0x14] ss:$8 sps:$4 sm:$0xff]   ;;  %v3567_v55 = vld [vmem:[#allocation11 + $0x10] ss:$8 sps:$4 sm:$0xff]  }
  0x9c   :  { %3496 = vmatpush3.bf16.msra.mxu0 %v3557_v2  ;;  %v3572_v56 = vld [vmem:[#allocation11 + $0x24] ss:$8 sps:$4 sm:$0xff]   ;;  %v3570_v57 = vld [vmem:[#allocation11 + $0x20] ss:$8 sps:$4 sm:$0xff]   ;;  %v3575_v58 = vld [vmem:[#allocation11 + $0x34] ss:$8 sps:$4 sm:$0xff]  }
  0x9d   :  { %3497 = vmatprep.subr.bf16.mxu0 %v4260_v0  ;;  %v3573_v59 = vld [vmem:[#allocation11 + $0x30] ss:$8 sps:$4 sm:$0xff]   ;;  %v3578_v60 = vld [vmem:[#allocation11 + $0x44] ss:$8 sps:$4 sm:$0xff]   ;;  %v3576_v61 = vld [vmem:[#allocation11 + $0x40] ss:$8 sps:$4 sm:$0xff]  }
  0x9e   :  { %v3581_v62 = vld [vmem:[#allocation11 + $0x54] ss:$8 sps:$4 sm:$0xff]   ;;  %v3579_v63 = vld [vmem:[#allocation11 + $0x50] ss:$8 sps:$4 sm:$0xff]   ;;  %v3582_v1 = vld [vmem:[#allocation11 + $0x60] ss:$8 sps:$4 sm:$0xff]  }
  0x9f   :  { %v3587_v2 = vld [vmem:[#allocation11 + $0x74] ss:$8 sps:$4 sm:$0xff]  }
  0xa0   :  { %3498 = vmatpush3.bf16.msra.mxu0 %v3558_v3  ;;  %v3585_v3 = vld [vmem:[#allocation11 + $0x70] ss:$8 sps:$4 sm:$0xff]   ;;  %v3588_v5 = vld [vmem:[#allocation13 + $0x4] ss:$16 sps:$4 sm:$0xff]  }
  0xa1   :  { %3499 = vmatprep.subr.bf16.mxu0 %v4260_v0  ;;  %1031 = vmatprep.subr.bf16.mxu1 %v3588_v5  ;;  %v3629_v5 = vld [vmem:[#allocation13 + $0xc0] ss:$16 sps:$4 sm:$0xff]  }
  0xa4   :  { %3500 = vmatpush3.bf16.msra.mxu0 %v191_v6  ;;  %v3592_v6 = vld [vmem:[#allocation13 + $0xc] ss:$16 sps:$4 sm:$0xff]  }
  0xa5   :  { %3505 = vmatprep.subr.bf16.mxu0 %v4260_v0 }
  0xa7   :  { %3502 = vmatmul.mubr.msk.bf16.vlgmr.msra.gmra.mrb[0].mxu0 %vm185_vm2, %v156_v7 }
  0xa8   :  { %3513 = vmatprep.mubr.msk.bf16.mxu0 %vm4261_vm0, %v4260_v0  ;;  %3506 = vmatpush3.bf16.msra.mxu0 %v3560_v8 }
  0xa9   :  { %3507 = vmatprep.subr.bf16.mxu0 %v4260_v0 }
  0xac   :  { %3508 = vmatpush3.bf16.msra.mxu0 %v3561_v9 }
  0xad   :  { %3509 = vmatprep.subr.bf16.mxu0 %v4260_v0 }
  0xb0   :  { %3510 = vmatpush3.bf16.msra.mxu0 %v3562_v10 }
  0xb1   :  { %3511 = vmatprep.subr.bf16.mxu0 %v4260_v0  ;;  %v3584_v0 = vld [vmem:[#allocation11 + $0x64] ss:$8 sps:$4 sm:$0xff]  }
  0xb4   :  { %3512 = vmatpush3.bf16.msra.mxu0 %v3563_v11 }
  0xb5   :  { %492 = vmatprep.subr.bf16.mxu0 %v3566_v52  ;;  %v3602_v52 = vld [vmem:[#allocation13 + $0x48] ss:$16 sps:$4 sm:$0xff]  }
 0x17a   :  { %v227_v12 = vpop.f32.mrb[0].mxu0 }
 0x17b   :  { %vm233_vm3 = vcmp.gt.f32.partialorder %v227_v12, 0.0  ;;  %v234_v13 = vmul.f32 0.2, %v227_v12  ;;  %v3503_v14 = vpop.f32.mrb[1].mxu0 }
 0x17c   :  { %v230_v15 = vpop.f32.mrb[2].mxu0 }
 0x17d   :  { %v235_v16 = vsel %vm233_vm3, %v227_v12, %v234_v13  ;;  %v3504_v17 = vpop.f32.mrb[3].mxu0 }
 0x17e   :  { %v237_v18 = vsel %vm236_vm4, %v235_v16, 0.0  ;;  %v246_v19 = vmul.f32 %v235_v16, %v235_v16 }
 0x17f   :  { %v238_v20 = vrot.slane %v237_v18, 4 }
 0x180   :  { %v247_v21 = vsel %vm236_vm4, %v246_v19, 0.0 }
 0x181   :  { %v239_v22 = vadd.f32 %v238_v20, %v237_v18  ;;  %v248_v23 = vrot.slane %v247_v21, 4 }
 0x183   :  { %v240_v24 = vrot.slane %v239_v22, 2  ;;  %v249_v25 = vadd.f32 %v248_v23, %v247_v21 }
 0x185   :  { %v241_v26 = vadd.f32 %v240_v24, %v239_v22  ;;  %v250_v27 = vrot.slane %v249_v25, 2 }
 0x187   :  { %v242_v28 = vrot.slane %v241_v26, 1  ;;  %v251_v29 = vadd.f32 %v250_v27, %v249_v25 }
 0x189   :  { %v243_v30 = vadd.f32 %v242_v28, %v241_v26  ;;  %v252_v31 = vrot.slane %v251_v29, 1 }
 0x18b   :  { %v245_v32 = vmul.f32 0.125, %v243_v30  ;;  %v253_v33 = vadd.f32 %v252_v31, %v251_v29  ;;  %v374_v31 = vld [vmem:[%s4596_s5] sm:$0x1] }
 0x18d   :  { %v254_v34 = vmul.f32 0.125, %v253_v33  ;;  %v255_v35 = vmul.f32 %v245_v32, %v245_v32 }
 0x18f   :  { %v256_v36 = vsub.f32 %v254_v34, %v255_v35  ;;  %v378_v34 = vld [vmem:[%s4597_s6] sm:$0x1] }
 0x191   :  { %v258_v37 = vadd.f32 0.8, %v256_v36 }
 0x193   :  { %4004 = vrsqrt.f32 %v258_v37 }
 0x19d   :  { %v4005_v42 = vpop.eup %4004 }
 0x19e   :  { %v260_v43 = vmul.f32 %v4005_v42, %v257_v40 }
 0x1a0   :  { %v262_v45 = vmul.f32 %v260_v43, %v245_v32  ;;  %v268_v46 = vrot.slane %v260_v43, %v4454_v41  ;;  %v3590_v43 = vld [vmem:[#allocation13 + $0x8] ss:$16 sps:$4 sm:$0xff]  }
 0x1a2   :  { %v263_v47 = vsub.f32 %v261_v44, %v262_v45  ;;  %v270_v48 = vmul.f32 %v268_v46, %v235_v16  ;;  %v3593_v45 = vld [vmem:[#allocation13] ss:$16 sps:$4 sm:$0xff]   ;;  %v3594_v46 = vld [vmem:[#allocation13 + $0x24] ss:$16 sps:$4 sm:$0xff]  }
 0x1a3   :  { %1032 = vmatpush1.bf16.msra.mxu1 %v3593_v45 }
 0x1a4   :  { %v275_v49 = vrot.slane %v263_v47, %v4454_v41  ;;  %v3598_v47 = vld [vmem:[#allocation13 + $0x2c] ss:$16 sps:$4 sm:$0xff]   ;;  %1033 = vmatprep.subr.bf16.mxu1 %v3594_v46 }
 0x1a6   :  { %v277_v50 = vadd.f32 %v275_v49, %v270_v48  ;;  %v3596_v48 = vld [vmem:[#allocation13 + $0x28] ss:$16 sps:$4 sm:$0xff]   ;;  %v3599_v49 = vld [vmem:[#allocation13 + $0x20] ss:$16 sps:$4 sm:$0xff]  }
 0x1a7   :  { %1034 = vmatpush1.bf16.msra.mxu1 %v3599_v49 }
 0x1a8   :  { %v278_v51 = vpack.c.bf16 %v277_v50, %v277_v50  ;;  %v3600_v50 = vld [vmem:[#allocation13 + $0x44] ss:$16 sps:$4 sm:$0xff]  }
 0x1a9   :  { %1035 = vmatprep.subr.bf16.mxu1 %v3600_v50 }
 0x1aa   :  { %3514 = vmatmul.mubr.msk.bf16.vlgmr.msra.gmra.mrb[4].mxu0 %vm236_vm4, %v278_v51  ;;  %v3604_v51 = vld [vmem:[#allocation13 + $0x4c] ss:$16 sps:$4 sm:$0xff]  }
 0x1ab   :  { %493 = vmatpush1.bf16.msra.mxu0 %v3564_v53  ;;  %524 = vmatprep.mubr.bf16.mxu0 %v4262_v4  ;;  %v3605_v53 = vld [vmem:[#allocation13 + $0x40] ss:$16 sps:$4 sm:$0xff]   ;;  %v3626_v4 = vld [vmem:[#allocation13 + $0xc8] ss:$16 sps:$4 sm:$0xff]  }
 0x1ac   :  { %494 = vmatprep.subr.bf16.mxu0 %v3569_v54  ;;  %1036 = vmatpush1.bf16.msra.mxu1 %v3605_v53  ;;  %v3606_v54 = vld [vmem:[#allocation13 + $0x64] ss:$16 sps:$4 sm:$0xff]  }
 0x1ad   :  { %1037 = vmatprep.subr.bf16.mxu1 %v3606_v54 }
 0x1af   :  { %495 = vmatpush1.bf16.msra.mxu0 %v3567_v55  ;;  %v3610_v55 = vld [vmem:[#allocation13 + $0x6c] ss:$16 sps:$4 sm:$0xff]  }
 0x1b0   :  { %496 = vmatprep.subr.bf16.mxu0 %v3572_v56  ;;  %v3608_v56 = vld [vmem:[#allocation13 + $0x68] ss:$16 sps:$4 sm:$0xff]  }
 0x1b3   :  { %497 = vmatpush1.bf16.msra.mxu0 %v3570_v57  ;;  %v3611_v57 = vld [vmem:[#allocation13 + $0x60] ss:$16 sps:$4 sm:$0xff]  }
 0x1b4   :  { %498 = vmatprep.subr.bf16.mxu0 %v3575_v58  ;;  %1038 = vmatpush1.bf16.msra.mxu1 %v3611_v57  ;;  %v3612_v58 = vld [vmem:[#allocation13 + $0x84] ss:$16 sps:$4 sm:$0xff]  }
 0x1b5   :  { %1039 = vmatprep.subr.bf16.mxu1 %v3612_v58 }
 0x1b7   :  { %499 = vmatpush1.bf16.msra.mxu0 %v3573_v59  ;;  %v3616_v59 = vld [vmem:[#allocation13 + $0x8c] ss:$16 sps:$4 sm:$0xff]  }
 0x1b8   :  { %500 = vmatprep.subr.bf16.mxu0 %v3578_v60  ;;  %v3614_v60 = vld [vmem:[#allocation13 + $0x88] ss:$16 sps:$4 sm:$0xff]  }
 0x1bb   :  { %501 = vmatpush1.bf16.msra.mxu0 %v3576_v61  ;;  %v3617_v61 = vld [vmem:[#allocation13 + $0x80] ss:$16 sps:$4 sm:$0xff]  }
 0x1bc   :  { %502 = vmatprep.subr.bf16.mxu0 %v3581_v62  ;;  %1040 = vmatpush1.bf16.msra.mxu1 %v3617_v61  ;;  %v3618_v62 = vld [vmem:[#allocation13 + $0xa4] ss:$16 sps:$4 sm:$0xff]  }
 0x1bd   :  { %1041 = vmatprep.subr.bf16.mxu1 %v3618_v62 }
 0x1bf   :  { %503 = vmatpush1.bf16.msra.mxu0 %v3579_v63  ;;  %v3622_v63 = vld [vmem:[#allocation13 + $0xac] ss:$16 sps:$4 sm:$0xff]  }
 0x1c0   :  { %504 = vmatprep.subr.bf16.mxu0 %v3584_v0  ;;  %v3620_v0 = vld [vmem:[#allocation13 + $0xa8] ss:$16 sps:$4 sm:$0xff]  }
 0x1c3   :  { %505 = vmatpush1.bf16.msra.mxu0 %v3582_v1  ;;  %v3623_v1 = vld [vmem:[#allocation13 + $0xa0] ss:$16 sps:$4 sm:$0xff]  }
 0x1c4   :  { %506 = vmatprep.subr.bf16.mxu0 %v3587_v2  ;;  %1042 = vmatpush1.bf16.msra.mxu1 %v3623_v1  ;;  %v3624_v2 = vld [vmem:[#allocation13 + $0xc4] ss:$16 sps:$4 sm:$0xff]  }
 0x1c5   :  { %1043 = vmatprep.subr.bf16.mxu1 %v3624_v2 }
 0x1c7   :  { %507 = vmatpush1.bf16.msra.mxu0 %v3585_v3  ;;  %v3628_v3 = vld [vmem:[#allocation13 + $0xcc] ss:$16 sps:$4 sm:$0xff]  }
 0x1c8   :  { %1072 = vmatprep.subr.bf16.mxu0 %v3592_v6  ;;  %1044 = vmatpush1.bf16.msra.mxu1 %v3629_v5  ;;  %v3630_v6 = vld [vmem:[#allocation13 + $0xe4] ss:$16 sps:$4 sm:$0xff]  }
 0x1c9   :  { %1045 = vmatprep.subr.bf16.mxu1 %v3630_v6 }
 0x27d   :  { %v348_v7 = vpop.f32.mrb[4].mxu0 }
 0x27e   :  { %vm354_vm5 = vcmp.gt.f32.partialorder %v348_v7, 0.0  ;;  %v355_v8 = vmul.f32 0.2, %v348_v7  ;;  %v3515_v9 = vpop.f32.mrb[5].mxu0 }
 0x27f   :  { %v351_v10 = vpop.f32.mrb[6].mxu0  ;;  %v3635_v9 = vld [vmem:[#allocation13 + $0xe0] ss:$16 sps:$4 sm:$0xff]  }
 0x280   :  { %v356_v11 = vsel %vm354_vm5, %v348_v7, %v355_v8  ;;  %v3516_v12 = vpop.f32.mrb[7].mxu0  ;;  %v3632_v7 = vld [vmem:[#allocation13 + $0xe8] ss:$16 sps:$4 sm:$0xff]   ;;  %v3634_v8 = vld [vmem:[#allocation13 + $0xec] ss:$16 sps:$4 sm:$0xff]   ;;  %1046 = vmatpush1.bf16.msra.mxu1 %v3635_v9 }
 0x281   :  { %v357_v13 = vrot.slane %v356_v11, 4  ;;  %v364_v14 = vmul.f32 %v356_v11, %v356_v11  ;;  %v3636_v10 = vld [vmem:[#allocation13 + $0x104] ss:$16 sps:$4 sm:$0xff]   ;;  %v3638_v12 = vld [vmem:[#allocation13 + $0x108] ss:$16 sps:$4 sm:$0xff]  }
 0x282   :  { %1047 = vmatprep.subr.bf16.mxu1 %v3636_v10 }
 0x283   :  { %v358_v15 = vadd.f32 %v357_v13, %v356_v11  ;;  %v365_v16 = vrot.slane %v364_v14, 4  ;;  %v3641_v13 = vld [vmem:[#allocation13 + $0x100] ss:$16 sps:$4 sm:$0xff]  }
 0x284   :  { %1048 = vmatpush1.bf16.msra.mxu1 %v3641_v13 }
 0x285   :  { %v359_v17 = vrot.slane %v358_v15, 2  ;;  %v366_v18 = vadd.f32 %v365_v16, %v364_v14  ;;  %v3642_v14 = vld [vmem:[#allocation13 + $0x124] ss:$16 sps:$4 sm:$0xff]   ;;  %v3644_v16 = vld [vmem:[#allocation13 + $0x128] ss:$16 sps:$4 sm:$0xff]  }
 0x286   :  { %1049 = vmatprep.subr.bf16.mxu1 %v3642_v14 }
 0x287   :  { %v360_v19 = vadd.f32 %v359_v17, %v358_v15  ;;  %v367_v20 = vrot.slane %v366_v18, 2  ;;  %v3646_v15 = vld [vmem:[#allocation13 + $0x12c] ss:$16 sps:$4 sm:$0xff]   ;;  %v3647_v17 = vld [vmem:[#allocation13 + $0x120] ss:$16 sps:$4 sm:$0xff]  }
 0x288   :  { %1050 = vmatpush1.bf16.msra.mxu1 %v3647_v17 }
 0x289   :  { %v361_v21 = vrot.slane %v360_v19, 1  ;;  %v368_v22 = vadd.f32 %v367_v20, %v366_v18  ;;  %v3648_v18 = vld [vmem:[#allocation13 + $0x144] ss:$16 sps:$4 sm:$0xff]   ;;  %v3650_v20 = vld [vmem:[#allocation13 + $0x148] ss:$16 sps:$4 sm:$0xff]  }
 0x28a   :  { %1051 = vmatprep.subr.bf16.mxu1 %v3648_v18 }
 0x28b   :  { %v362_v23 = vadd.f32 %v361_v21, %v360_v19  ;;  %v369_v24 = vrot.slane %v368_v22, 1  ;;  %v3652_v19 = vld [vmem:[#allocation13 + $0x14c] ss:$16 sps:$4 sm:$0xff]   ;;  %v3653_v21 = vld [vmem:[#allocation13 + $0x140] ss:$16 sps:$4 sm:$0xff]  }
 0x28c   :  { %1052 = vmatpush1.bf16.msra.mxu1 %v3653_v21 }
 0x28d   :  { %v363_v25 = vmul.f32 0.125, %v362_v23  ;;  %v370_v26 = vadd.f32 %v369_v24, %v368_v22  ;;  %v3654_v22 = vld [vmem:[#allocation13 + $0x164] ss:$16 sps:$4 sm:$0xff]   ;;  %v3658_v23 = vld [vmem:[#allocation13 + $0x16c] ss:$16 sps:$4 sm:$0xff]  }
 0x28e   :  { %v3656_v24 = vld [vmem:[#allocation13 + $0x168] ss:$16 sps:$4 sm:$0xff]   ;;  %1053 = vmatprep.subr.bf16.mxu1 %v3654_v22 }
 0x28f   :  { %v371_v27 = vmul.f32 0.125, %v370_v26  ;;  %v372_v28 = vmul.f32 %v363_v25, %v363_v25  ;;  %v3660_v26 = vld [vmem:[#allocation13 + $0x184] ss:$16 sps:$4 sm:$0xff]  }
 0x291   :  { %v373_v29 = vsub.f32 %v371_v27, %v372_v28  ;;  %v3664_v27 = vld [vmem:[#allocation13 + $0x18c] ss:$16 sps:$4 sm:$0xff]   ;;  %v3662_v28 = vld [vmem:[#allocation13 + $0x188] ss:$16 sps:$4 sm:$0xff]  }
 0x293   :  { %v375_v30 = vadd.f32 0.8, %v373_v29  ;;  %v3665_v29 = vld [vmem:[#allocation13 + $0x180] ss:$16 sps:$4 sm:$0xff]  }
 0x295   :  { %4006 = vrsqrt.f32 %v375_v30  ;;  %v3666_v30 = vld [vmem:[#allocation13 + $0x1a4] ss:$16 sps:$4 sm:$0xff]  }
 0x29f   :  { %v4007_v32 = vpop.eup %4006 }
 0x2a0   :  { %v377_v33 = vmul.f32 %v4007_v32, %v374_v31  ;;  %v3670_v31 = vld [vmem:[#allocation13 + $0x1ac] ss:$16 sps:$4 sm:$0xff]   ;;  %v3668_v32 = vld [vmem:[#allocation13 + $0x1a8] ss:$16 sps:$4 sm:$0xff]  }
 0x2a2   :  { %v379_v35 = vmul.f32 %v377_v33, %v363_v25  ;;  %v385_v36 = vrot.slane %v377_v33, %v4454_v41  ;;  %v3659_v25 = vld [vmem:[#allocation13 + $0x160] ss:$16 sps:$4 sm:$0xff]  }
 0x2a3   :  { %1054 = vmatpush1.bf16.msra.mxu1 %v3659_v25  ;;  %v3671_v33 = vld [vmem:[#allocation13 + $0x1a0] ss:$16 sps:$4 sm:$0xff]  }
 0x2a4   :  { %v380_v37 = vsub.f32 %v378_v34, %v379_v35  ;;  %v387_v38 = vmul.f32 %v385_v36, %v356_v11  ;;  %v3640_v11 = vld [vmem:[#allocation13 + $0x10c] ss:$16 sps:$4 sm:$0xff]   ;;  %1055 = vmatprep.subr.bf16.mxu1 %v3660_v26  ;;  %v3672_v34 = vld [vmem:[#allocation13 + $0x1c4] ss:$16 sps:$4 sm:$0xff]   ;;  %v3674_v36 = vld [vmem:[#allocation13 + $0x1c8] ss:$16 sps:$4 sm:$0xff]  }
 0x2a5   :  { %v3676_v35 = vld [vmem:[#allocation13 + $0x1cc] ss:$16 sps:$4 sm:$0xff]  }
 0x2a6   :  { %v392_v40 = vrot.slane %v380_v37, %v4454_v41  ;;  %v3677_v37 = vld [vmem:[#allocation13 + $0x1c0] ss:$16 sps:$4 sm:$0xff]  }
 0x2a7   :  { %1056 = vmatpush1.bf16.msra.mxu1 %v3665_v29 }
 0x2a8   :  { %v394_v42 = vadd.f32 %v392_v40, %v387_v38  ;;  %1057 = vmatprep.subr.bf16.mxu1 %v3666_v30  ;;  %v3678_v38 = vld [vmem:[#allocation13 + $0x1e4] ss:$16 sps:$4 sm:$0xff]   ;;  %v3682_v40 = vld [vmem:[#allocation13 + $0x1ec] ss:$16 sps:$4 sm:$0xff]  }
 0x2aa   :  { %v395_v44 = vpack.c.bf16 %v394_v42, %v394_v42  ;;  %v3680_v42 = vld [vmem:[#allocation13 + $0x1e8] ss:$16 sps:$4 sm:$0xff]  }
 0x2ab   :  { %1058 = vmatpush1.bf16.msra.mxu1 %v3671_v33 }
 0x2ac   :  { %525 = vmatmul.mubr.bf16.vlgmr.msra.gmra.mrb[8].mxu0 %v395_v44  ;;  %1059 = vmatprep.subr.bf16.mxu1 %v3672_v34  ;;  %v4476_v34 = vsub.s32 1, %v4451_v39 }
 0x2ad   :  { %1073 = vmatpush1.bf16.msra.mxu0 %v3590_v43  ;;  %v3683_v43 = vld [vmem:[#allocation13 + $0x1e0] ss:$16 sps:$4 sm:$0xff]  }
 0x2ae   :  { %1074 = vmatprep.subr.bf16.mxu0 %v3598_v47 }
 0x2af   :  { %1060 = vmatpush1.bf16.msra.mxu1 %v3677_v37 }
 0x2b0   :  { %1061 = vmatprep.subr.bf16.mxu1 %v3678_v38 }
 0x2b1   :  { %1075 = vmatpush1.bf16.msra.mxu0 %v3596_v48 }
 0x2b2   :  { %1076 = vmatprep.subr.bf16.mxu0 %v3604_v51 }
 0x2b3   :  { %1062 = vmatpush1.bf16.msra.mxu1 %v3683_v43 }
 0x2b5   :  { %1077 = vmatpush1.bf16.msra.mxu0 %v3602_v52 }
 0x2b6   :  { %1078 = vmatprep.subr.bf16.mxu0 %v3610_v55 }
 0x2b9   :  { %1079 = vmatpush1.bf16.msra.mxu0 %v3608_v56 }
 0x2ba   :  { %1080 = vmatprep.subr.bf16.mxu0 %v3616_v59 }
 0x2bd   :  { %1081 = vmatpush1.bf16.msra.mxu0 %v3614_v60 }
 0x2be   :  { %1082 = vmatprep.subr.bf16.mxu0 %v3622_v63 }
 0x2c1   :  { %1083 = vmatpush1.bf16.msra.mxu0 %v3620_v0 }
 0x2c2   :  { %1084 = vmatprep.subr.bf16.mxu0 %v3628_v3 }
 0x2c5   :  { %1085 = vmatpush1.bf16.msra.mxu0 %v3626_v4 }
 0x2c6   :  { %1086 = vmatprep.subr.bf16.mxu0 %v3634_v8 }
 0x2c9   :  { %1087 = vmatpush1.bf16.msra.mxu0 %v3632_v7 }
 0x2ca   :  { %1088 = vmatprep.subr.bf16.mxu0 %v3640_v11 }
 0x2cd   :  { %1089 = vmatpush1.bf16.msra.mxu0 %v3638_v12 }
 0x2ce   :  { %1090 = vmatprep.subr.bf16.mxu0 %v3646_v15 }
 0x2d1   :  { %1091 = vmatpush1.bf16.msra.mxu0 %v3644_v16 }
 0x2d2   :  { %1092 = vmatprep.subr.bf16.mxu0 %v3652_v19 }
 0x2d5   :  { %1093 = vmatpush1.bf16.msra.mxu0 %v3650_v20 }
 0x2d6   :  { %1094 = vmatprep.subr.bf16.mxu0 %v3658_v23 }
 0x2d9   :  { %1095 = vmatpush1.bf16.msra.mxu0 %v3656_v24  ;;  %v4263_v24 = vmov 1966171168  }
 0x2da   :  { %1096 = vmatprep.subr.bf16.mxu0 %v3664_v27  ;;  %v582_v25 = vunpack.c.l.s4 %v4263_v24  ;;  %v3737_v24 = vld [vmem:[#allocation14 + $0x1cc] ss:$28 sps:$4 sm:$0xff]  }
 0x2dc   :  { %v583_v26 = vunpack.c.0.s8 %v582_v25  ;;  %v3732_v25 = vld [vmem:[#allocation14 + $0x1c0] ss:$28 sps:$4 sm:$0xff]  }
 0x2dd   :  { %1097 = vmatpush1.bf16.msra.mxu0 %v3662_v28 }
 0x2de   :  { %1098 = vmatprep.subr.bf16.mxu0 %v3670_v31  ;;  %v4468_v28 = vsub.s32 %v583_v26, %v4451_v39  ;;  %v3735_v26 = vld [vmem:[#allocation14 + $0x1c8] ss:$28 sps:$4 sm:$0xff]  }
 0x2e1   :  { %1099 = vmatpush1.bf16.msra.mxu0 %v3668_v32  ;;  %v573_v32 = vld [vmem:[%s4599_s8] sm:$0x3] }
 0x2e2   :  { %1100 = vmatprep.subr.bf16.mxu0 %v3676_v35 }
 0x2e5   :  { %1101 = vmatpush1.bf16.msra.mxu0 %v3674_v36 }
 0x2e6   :  { %1102 = vmatprep.subr.bf16.mxu0 %v3682_v40 }
 0x2e9   :  { %1103 = vmatpush1.bf16.msra.mxu0 %v3680_v42 }
 0x37f   :  { %v526_v44 = vpop.f32.mrb[8].mxu0 }
 0x380   :  { %vm533_vm6 = vcmp.gt.f32.partialorder %v526_v44, 0.0  ;;  %v535_v45 = vmul.f32 0.2, %v526_v44  ;;  %v528_v46 = vpop.f32.mrb[9].mxu0 }
 0x381   :  { %vm534_vm7 = vcmp.gt.f32.partialorder %v528_v46, 0.0  ;;  %v536_v47 = vmul.f32 0.2, %v528_v46  ;;  %v530_v48 = vpop.f32.mrb[10].mxu0 }
 0x382   :  { %v537_v49 = vsel %vm533_vm6, %v526_v44, %v535_v45  ;;  %v531_v50 = vpop.f32.mrb[11].mxu0 }
 0x383   :  { %v539_v51 = vrot.slane %v537_v49, 4  ;;  %v553_v52 = vmul.f32 %v537_v49, %v537_v49  ;;  %v538_v53 = vsel %vm534_vm7, %v528_v46, %v536_v47  ;;  %v597_v46 = vld [vmem:[%s4600_s9] sm:$0x3] }
 0x384   :  { %v545_v54 = vrot.slane %v538_v53, 4  ;;  %v554_v55 = vmul.f32 %v538_v53, %v538_v53 }
 0x385   :  { %v540_v56 = vadd.f32 %v539_v51, %v537_v49  ;;  %v555_v57 = vrot.slane %v553_v52, 4 }
 0x386   :  { %v546_v58 = vadd.f32 %v545_v54, %v538_v53  ;;  %v561_v59 = vrot.slane %v554_v55, 4 }
 0x387   :  { %v541_v60 = vrot.slane %v540_v56, 2  ;;  %v556_v61 = vadd.f32 %v555_v57, %v553_v52  ;;  %v3684_v57 = vld [vmem:[#allocation14] ss:$28 sps:$4 sm:$0xff]  }
 0x388   :  { %v547_v62 = vrot.slane %v546_v58, 2  ;;  %v562_v63 = vadd.f32 %v561_v59, %v554_v55  ;;  %v3692_v59 = vld [vmem:[#allocation14 + $0x3c] ss:$28 sps:$4 sm:$0xff]  }
 0x389   :  { %v542_v0 = vadd.f32 %v541_v60, %v540_v56  ;;  %v557_v1 = vrot.slane %v556_v61, 2  ;;  %v3695_v60 = vld [vmem:[#allocation14 + $0x44] ss:$28 sps:$4 sm:$0xff]  }
 0x38a   :  { %v548_v2 = vadd.f32 %v547_v62, %v546_v58  ;;  %v563_v3 = vrot.slane %v562_v63, 2  ;;  %v3687_v58 = vld [vmem:[#allocation14 + $0x8] ss:$28 sps:$4 sm:$0xff]   ;;  %v3693_v62 = vld [vmem:[#allocation14 + $0x40] ss:$28 sps:$4 sm:$0xff]  }
 0x38b   :  { %v543_v4 = vrot.slane %v542_v0, 1  ;;  %v558_v5 = vadd.f32 %v557_v1, %v556_v61  ;;  %v3690_v61 = vld [vmem:[#allocation14 + $0x38] ss:$28 sps:$4 sm:$0xff]   ;;  %v3696_v1 = vld [vmem:[#allocation14 + $0x70] ss:$28 sps:$4 sm:$0xff]  }
 0x38c   :  { %v549_v6 = vrot.slane %v548_v2, 1  ;;  %v564_v7 = vadd.f32 %v563_v3, %v562_v63  ;;  %v3698_v63 = vld [vmem:[#allocation14 + $0x74] ss:$28 sps:$4 sm:$0xff]   ;;  %v3704_v3 = vld [vmem:[#allocation14 + $0xac] ss:$28 sps:$4 sm:$0xff]  }
 0x38d   :  { %v544_v8 = vadd.f32 %v543_v4, %v542_v0  ;;  %v559_v9 = vrot.slane %v558_v5, 1  ;;  %v3701_v0 = vld [vmem:[#allocation14 + $0x7c] ss:$28 sps:$4 sm:$0xff]   ;;  %v3707_v4 = vld [vmem:[#allocation14 + $0xb4] ss:$28 sps:$4 sm:$0xff]  }
 0x38e   :  { %v565_v10 = vrot.slane %v564_v7, 1  ;;  %v550_v11 = vadd.f32 %v549_v6, %v548_v2  ;;  %v3699_v2 = vld [vmem:[#allocation14 + $0x78] ss:$28 sps:$4 sm:$0xff]   ;;  %v3705_v6 = vld [vmem:[#allocation14 + $0xb0] ss:$28 sps:$4 sm:$0xff]  }
 0x38f   :  { %v551_v12 = vmul.f32 0.125, %v544_v8  ;;  %v560_v13 = vadd.f32 %v559_v9, %v558_v5  ;;  %v3702_v5 = vld [vmem:[#allocation14 + $0xa8] ss:$28 sps:$4 sm:$0xff]   ;;  %v3708_v9 = vld [vmem:[#allocation14 + $0xe0] ss:$28 sps:$4 sm:$0xff]  }
 0x390   :  { %v566_v14 = vadd.f32 %v565_v10, %v564_v7  ;;  %v552_v15 = vmul.f32 0.125, %v550_v11  ;;  %v3710_v7 = vld [vmem:[#allocation14 + $0xe4] ss:$28 sps:$4 sm:$0xff]   ;;  %v3713_v8 = vld [vmem:[#allocation14 + $0xec] ss:$28 sps:$4 sm:$0xff]  }
 0x391   :  { %v567_v16 = vmul.f32 0.125, %v560_v13  ;;  %v569_v17 = vmul.f32 %v551_v12, %v551_v12  ;;  %v3711_v10 = vld [vmem:[#allocation14 + $0xe8] ss:$28 sps:$4 sm:$0xff]   ;;  %v3716_v11 = vld [vmem:[#allocation14 + $0x11c] ss:$28 sps:$4 sm:$0xff]  }
 0x392   :  { %v568_v18 = vmul.f32 0.125, %v566_v14  ;;  %v570_v19 = vmul.f32 %v552_v15, %v552_v15  ;;  %v3714_v13 = vld [vmem:[#allocation14 + $0x118] ss:$28 sps:$4 sm:$0xff]   ;;  %v3717_v14 = vld [vmem:[#allocation14 + $0x120] ss:$28 sps:$4 sm:$0xff]  }
 0x393   :  { %v571_v20 = vsub.f32 %v567_v16, %v569_v17  ;;  %v3725_v16 = vld [vmem:[#allocation14 + $0x15c] ss:$28 sps:$4 sm:$0xff]   ;;  %v3720_v17 = vld [vmem:[#allocation14 + $0x150] ss:$28 sps:$4 sm:$0xff]  }
 0x394   :  { %v572_v21 = vsub.f32 %v568_v18, %v570_v19  ;;  %v3723_v18 = vld [vmem:[#allocation14 + $0x158] ss:$28 sps:$4 sm:$0xff]   ;;  %v3728_v19 = vld [vmem:[#allocation14 + $0x18c] ss:$28 sps:$4 sm:$0xff]  }
 0x395   :  { %v574_v22 = vadd.f32 0.8, %v571_v20  ;;  %v3731_v20 = vld [vmem:[#allocation14 + $0x194] ss:$28 sps:$4 sm:$0xff]  }
 0x396   :  { %v575_v23 = vadd.f32 0.8, %v572_v21  ;;  %v3726_v21 = vld [vmem:[#allocation14 + $0x188] ss:$28 sps:$4 sm:$0xff]  }
 0x397   :  { %4008 = vrsqrt.f32 %v574_v22  ;;  %v3729_v22 = vld [vmem:[#allocation14 + $0x190] ss:$28 sps:$4 sm:$0xff]  }
 0x398   :  { %4010 = vrsqrt.f32 %v575_v23  ;;  %v3734_v23 = vld [vmem:[#allocation14 + $0x1c4] ss:$28 sps:$4 sm:$0xff]  }
 0x3a1   :  { %v4009_v27 = vpop.eup %4008 }
 0x3a2   :  { %v4011_v29 = vpop.eup %4010 }
 0x3a3   :  { %v580_v30 = vcombine.low %v4009_v27, %v4011_v29  ;;  %v3740_v27 = vld [vmem:[#allocation14 + $0x1fc] ss:$28 sps:$4 sm:$0xff]   ;;  %v3743_v29 = vld [vmem:[#allocation14 + $0x204] ss:$28 sps:$4 sm:$0xff]  }
 0x3a5   :  { %v587_v31 = vrot.slane %v580_v30, %v4468_v28  ;;  %v3738_v30 = vld [vmem:[#allocation14 + $0x1f8] ss:$28 sps:$4 sm:$0xff]  }
 0x3a7   :  { %v594_v33 = vrot.slane %v587_v31, %v4468_v28  ;;  %v3741_v31 = vld [vmem:[#allocation14 + $0x200] ss:$28 sps:$4 sm:$0xff]  }
 0x3a9   :  { %v596_v35 = vmul.f32 %v594_v33, %v573_v32  ;;  %v3746_v32 = vld [vmem:[#allocation14 + $0x234] ss:$28 sps:$4 sm:$0xff]   ;;  %v3749_v33 = vld [vmem:[#allocation14 + $0x23c] ss:$28 sps:$4 sm:$0xff]  }
 0x3ab   :  { %v602_v36 = vrot.slane %v596_v35, %v4454_v41  ;;  %v606_v37 = vrot.slane %v596_v35, %v4476_v34  ;;  %v3744_v35 = vld [vmem:[#allocation14 + $0x230] ss:$28 sps:$4 sm:$0xff]  }
 0x3ad   :  { %v609_v38 = vmul.f32 %v602_v36, %v551_v12  ;;  %v610_v40 = vmul.f32 %v606_v37, %v552_v15  ;;  %v631_v42 = vmul.f32 %v606_v37, %v538_v53  ;;  %v630_v43 = vmul.f32 %v602_v36, %v537_v49  ;;  %v3686_v49 = vld [vmem:[#allocation14 + $0x4] ss:$28 sps:$4 sm:$0xff]   ;;  %v3689_v53 = vld [vmem:[#allocation14 + $0xc] ss:$28 sps:$4 sm:$0xff]   ;;  %v3722_v15 = vld [vmem:[#allocation14 + $0x154] ss:$28 sps:$4 sm:$0xff]  }
 0x3ae   :  { %2766 = vmatprep.subr.bf16.mxu1 %v3686_v49  ;;  %2848 = vmatprep.subr.bf16.mxu0 %v3689_v53  ;;  %v3719_v12 = vld [vmem:[#allocation14 + $0x124] ss:$28 sps:$4 sm:$0xff]   ;;  %v3747_v36 = vld [vmem:[#allocation14 + $0x238] ss:$28 sps:$4 sm:$0xff]   ;;  %v3752_v37 = vld [vmem:[#allocation14 + $0x26c] ss:$28 sps:$4 sm:$0xff]  }
 0x3af   :  { %v613_v44 = vcombine.low %v609_v38, %v610_v40  ;;  %v3755_v38 = vld [vmem:[#allocation14 + $0x274] ss:$28 sps:$4 sm:$0xff]   ;;  %v3750_v40 = vld [vmem:[#allocation14 + $0x268] ss:$28 sps:$4 sm:$0xff]  }
 0x3b0   :  { %v3776_v49 = vld [vmem:[#allocation14 + $0x34c] ss:$28 sps:$4 sm:$0xff]   ;;  %v3779_v53 = vld [vmem:[#allocation14 + $0x354] ss:$28 sps:$4 sm:$0xff]  }
 0x3b1   :  { %v620_v45 = vrot.slane %v613_v44, %v4468_v28  ;;  %v3761_v44 = vld [vmem:[#allocation14 + $0x2ac] ss:$28 sps:$4 sm:$0xff]  }
 0x3b3   :  { %v627_v47 = vrot.slane %v620_v45, %v4468_v28  ;;  %v3756_v45 = vld [vmem:[#allocation14 + $0x2a0] ss:$28 sps:$4 sm:$0xff]  }
 0x3b5   :  { %v629_v48 = vsub.f32 %v597_v46, %v627_v47  ;;  %v3759_v46 = vld [vmem:[#allocation14 + $0x2a8] ss:$28 sps:$4 sm:$0xff]   ;;  %v3762_v47 = vld [vmem:[#allocation14 + $0x2d8] ss:$28 sps:$4 sm:$0xff]  }
 0x3b7   :  { %v640_v50 = vrot.slane %v629_v48, %v4476_v34  ;;  %v636_v51 = vrot.slane %v629_v48, %v4454_v41  ;;  %v3764_v48 = vld [vmem:[#allocation14 + $0x2dc] ss:$28 sps:$4 sm:$0xff]  }
 0x3b9   :  { %v644_v52 = vadd.f32 %v640_v50, %v631_v42  ;;  %v643_v54 = vadd.f32 %v636_v51, %v630_v43  ;;  %v3753_v42 = vld [vmem:[#allocation14 + $0x270] ss:$28 sps:$4 sm:$0xff]   ;;  %v3758_v43 = vld [vmem:[#allocation14 + $0x2a4] ss:$28 sps:$4 sm:$0xff]  }
 0x3ba   :  { %v3765_v50 = vld [vmem:[#allocation14 + $0x2e0] ss:$28 sps:$4 sm:$0xff]  }
 0x3bb   :  { %v646_v55 = vpack.c.bf16 %v644_v52, %v644_v52  ;;  %v645_v56 = vpack.c.bf16 %v643_v54, %v643_v54  ;;  %v3767_v51 = vld [vmem:[#allocation14 + $0x2e4] ss:$28 sps:$4 sm:$0xff]   ;;  %v3770_v52 = vld [vmem:[#allocation14 + $0x314] ss:$28 sps:$4 sm:$0xff]   ;;  %v3773_v54 = vld [vmem:[#allocation14 + $0x31c] ss:$28 sps:$4 sm:$0xff]  }
 0x3bd   :  { %1063 = vmatprep.mubr.bf16.mxu1 %v646_v55  ;;  %1104 = vmatprep.mubr.bf16.mxu0 %v646_v55  ;;  %v3768_v55 = vld [vmem:[#allocation14 + $0x310] ss:$28 sps:$4 sm:$0xff]  }
 0x3be   :  { %1064 = vmatmul.mubr.bf16.vlgmr.msra.gmra.mrb[0].mxu1 %v645_v56  ;;  %1105 = vmatmul.mubr.bf16.vlgmr.msra.gmra.mrb[12].mxu0 %v645_v56  ;;  %v3771_v56 = vld [vmem:[#allocation14 + $0x318] ss:$28 sps:$4 sm:$0xff]  }
 0x3bf   :  { %2767 = vmatpush1.bf16.msra.mxu1 %v3684_v57  ;;  %2849 = vmatpush1.bf16.msra.mxu0 %v3687_v58  ;;  %v3774_v57 = vld [vmem:[#allocation14 + $0x348] ss:$28 sps:$4 sm:$0xff]   ;;  %v3777_v58 = vld [vmem:[#allocation14 + $0x350] ss:$28 sps:$4 sm:$0xff]  }
 0x3c0   :  { %2768 = vmatprep.subr.bf16.mxu1 %v3692_v59  ;;  %2850 = vmatprep.subr.bf16.mxu0 %v3695_v60  ;;  %v3782_v59 = vld [vmem:[#allocation14 + $0x384] ss:$28 sps:$4 sm:$0xff]   ;;  %v3785_v60 = vld [vmem:[#allocation14 + $0x38c] ss:$28 sps:$4 sm:$0xff]  }
 0x3c3   :  { %2769 = vmatpush1.bf16.msra.mxu1 %v3690_v61  ;;  %2851 = vmatpush1.bf16.msra.mxu0 %v3693_v62 }
 0x3c4   :  { %2770 = vmatprep.subr.bf16.mxu1 %v3698_v63  ;;  %2852 = vmatprep.subr.bf16.mxu0 %v3701_v0 }
 0x3c7   :  { %2771 = vmatpush1.bf16.msra.mxu1 %v3696_v1  ;;  %2853 = vmatpush1.bf16.msra.mxu0 %v3699_v2 }
 0x3c8   :  { %2772 = vmatprep.subr.bf16.mxu1 %v3704_v3  ;;  %2854 = vmatprep.subr.bf16.mxu0 %v3707_v4 }
 0x3cb   :  { %2773 = vmatpush1.bf16.msra.mxu1 %v3702_v5  ;;  %2855 = vmatpush1.bf16.msra.mxu0 %v3705_v6 }
 0x3cc   :  { %2774 = vmatprep.subr.bf16.mxu1 %v3710_v7  ;;  %2856 = vmatprep.subr.bf16.mxu0 %v3713_v8 }
 0x3cf   :  { %2775 = vmatpush1.bf16.msra.mxu1 %v3708_v9  ;;  %2857 = vmatpush1.bf16.msra.mxu0 %v3711_v10 }
 0x3d0   :  { %2776 = vmatprep.subr.bf16.mxu1 %v3716_v11  ;;  %2858 = vmatprep.subr.bf16.mxu0 %v3719_v12 }
 0x3d3   :  { %2777 = vmatpush1.bf16.msra.mxu1 %v3714_v13  ;;  %2859 = vmatpush1.bf16.msra.mxu0 %v3717_v14 }
 0x3d4   :  { %2778 = vmatprep.subr.bf16.mxu1 %v3722_v15  ;;  %2860 = vmatprep.subr.bf16.mxu0 %v3725_v16 }
 0x3d7   :  { %2779 = vmatpush1.bf16.msra.mxu1 %v3720_v17  ;;  %2861 = vmatpush1.bf16.msra.mxu0 %v3723_v18 }
 0x3d8   :  { %2780 = vmatprep.subr.bf16.mxu1 %v3728_v19  ;;  %2862 = vmatprep.subr.bf16.mxu0 %v3731_v20 }
 0x3db   :  { %2781 = vmatpush1.bf16.msra.mxu1 %v3726_v21  ;;  %2863 = vmatpush1.bf16.msra.mxu0 %v3729_v22 }
 0x3dc   :  { %2782 = vmatprep.subr.bf16.mxu1 %v3734_v23  ;;  %2864 = vmatprep.subr.bf16.mxu0 %v3737_v24 }
 0x3df   :  { %2783 = vmatpush1.bf16.msra.mxu1 %v3732_v25  ;;  %2865 = vmatpush1.bf16.msra.mxu0 %v3735_v26 }
 0x3e0   :  { %2784 = vmatprep.subr.bf16.mxu1 %v3740_v27  ;;  %2866 = vmatprep.subr.bf16.mxu0 %v3743_v29 }
 0x3e3   :  { %2785 = vmatpush1.bf16.msra.mxu1 %v3738_v30  ;;  %2867 = vmatpush1.bf16.msra.mxu0 %v3741_v31 }
 0x3e4   :  { %2786 = vmatprep.subr.bf16.mxu1 %v3746_v32  ;;  %2868 = vmatprep.subr.bf16.mxu0 %v3749_v33 }
 0x3e7   :  { %2787 = vmatpush1.bf16.msra.mxu1 %v3744_v35  ;;  %2869 = vmatpush1.bf16.msra.mxu0 %v3747_v36 }
 0x3e8   :  { %2788 = vmatprep.subr.bf16.mxu1 %v3752_v37  ;;  %2870 = vmatprep.subr.bf16.mxu0 %v3755_v38 }
 0x3eb   :  { %2789 = vmatpush1.bf16.msra.mxu1 %v3750_v40  ;;  %2871 = vmatpush1.bf16.msra.mxu0 %v3753_v42 }
 0x3ec   :  { %2790 = vmatprep.subr.bf16.mxu1 %v3758_v43  ;;  %2872 = vmatprep.subr.bf16.mxu0 %v3761_v44 }
 0x3ef   :  { %2791 = vmatpush1.bf16.msra.mxu1 %v3756_v45  ;;  %2873 = vmatpush1.bf16.msra.mxu0 %v3759_v46 }
 0x3f0   :  { %2792 = vmatprep.subr.bf16.mxu1 %v3764_v48  ;;  %2874 = vmatprep.subr.bf16.mxu0 %v3767_v51 }
 0x3f3   :  { %2793 = vmatpush1.bf16.msra.mxu1 %v3762_v47  ;;  %2875 = vmatpush1.bf16.msra.mxu0 %v3765_v50 }
 0x3f4   :  { %2794 = vmatprep.subr.bf16.mxu1 %v3770_v52  ;;  %2876 = vmatprep.subr.bf16.mxu0 %v3773_v54 }
 0x3f7   :  { %2795 = vmatpush1.bf16.msra.mxu1 %v3768_v55  ;;  %2877 = vmatpush1.bf16.msra.mxu0 %v3771_v56 }
 0x3f8   :  { %2796 = vmatprep.subr.bf16.mxu1 %v3776_v49  ;;  %2878 = vmatprep.subr.bf16.mxu0 %v3779_v53 }
 0x3fb   :  { %2797 = vmatpush1.bf16.msra.mxu1 %v3774_v57  ;;  %2879 = vmatpush1.bf16.msra.mxu0 %v3777_v58 }
 0x3fc   :  { %2807 = vmatprep.subr.bf16.mxu1 %v3782_v59  ;;  %2889 = vmatprep.subr.bf16.mxu0 %v3785_v60 }
 0x491   :  { %v1065_v61 = vpop.f32.mrb[0].mxu1  ;;  %v1106_v62 = vpop.f32.mrb[12].mxu0 }
 0x492   :  { %vm1113_vm8 = vcmp.gt.f32.partialorder %v1065_v61, 0.0  ;;  %v1117_v63 = vmul.f32 0.2, %v1065_v61  ;;  %vm1115_vm9 = vcmp.gt.f32.partialorder %v1106_v62, 0.0  ;;  %v1119_v0 = vmul.f32 0.2, %v1106_v62 }
 0x493   :  { %v1067_v1 = vpop.f32.mrb[1].mxu1  ;;  %v1108_v2 = vpop.f32.mrb[13].mxu0 }
 0x494   :  { %v4487_v3 = vsel %vm1113_vm8, %v1065_v61, %v1117_v63  ;;  %v4489_v4 = vsel %vm1115_vm9, %v1106_v62, %v1119_v0  ;;  %vm1114_vm10 = vcmp.gt.f32.partialorder %v1067_v1, 0.0  ;;  %v1118_v5 = vmul.f32 0.2, %v1067_v1  ;;  %v1069_v6 = vpop.f32.mrb[2].mxu1  ;;  %v1110_v7 = vpop.f32.mrb[14].mxu0 }
 0x495   :  { %v1125_v8 = vrot.slane %v4487_v3, 4  ;;  %v1153_v9 = vmul.f32 %v4487_v3, %v4487_v3  ;;  %v1137_v10 = vrot.slane %v4489_v4, 4  ;;  %v1155_v11 = vmul.f32 %v4489_v4, %v4489_v4  ;;  %v1070_v12 = vpop.f32.mrb[3].mxu1  ;;  %v1111_v13 = vpop.f32.mrb[15].mxu0 }
 0x496   :  { %v4497_v14 = vsel %vm1114_vm10, %v1067_v1, %v1118_v5  ;;  %vm1116_vm11 = vcmp.gt.f32.partialorder %v1108_v2, 0.0  ;;  %v1120_v15 = vmul.f32 0.2, %v1108_v2 }
 0x497   :  { %v1126_v16 = vadd.f32 %v1125_v8, %v4487_v3  ;;  %v1157_v17 = vrot.slane %v1153_v9, 4  ;;  %v1138_v18 = vadd.f32 %v1137_v10, %v4489_v4  ;;  %v1169_v19 = vrot.slane %v1155_v11, 4 }
 0x498   :  { %v1131_v20 = vrot.slane %v4497_v14, 4  ;;  %v1154_v21 = vmul.f32 %v4497_v14, %v4497_v14  ;;  %v4504_v22 = vsel %vm1116_vm11, %v1108_v2, %v1120_v15 }
 0x499   :  { %v1127_v23 = vrot.slane %v1126_v16, 2  ;;  %v1158_v24 = vadd.f32 %v1157_v17, %v1153_v9  ;;  %v1139_v25 = vrot.slane %v1138_v18, 2  ;;  %v1170_v26 = vadd.f32 %v1169_v19, %v1155_v11 }
 0x49a   :  { %v1132_v27 = vadd.f32 %v1131_v20, %v4497_v14  ;;  %v1163_v29 = vrot.slane %v1154_v21, 4  ;;  %v1143_v30 = vrot.slane %v4504_v22, 4  ;;  %v1156_v31 = vmul.f32 %v4504_v22, %v4504_v22 }
 0x49b   :  { %v1128_v32 = vadd.f32 %v1127_v23, %v1126_v16  ;;  %v1159_v33 = vrot.slane %v1158_v24, 2  ;;  %v1140_v35 = vadd.f32 %v1139_v25, %v1138_v18  ;;  %v1171_v36 = vrot.slane %v1170_v26, 2 }
 0x49c   :  { %v1133_v37 = vrot.slane %v1132_v27, 2  ;;  %v1164_v38 = vadd.f32 %v1163_v29, %v1154_v21  ;;  %v1144_v40 = vadd.f32 %v1143_v30, %v4504_v22  ;;  %v1175_v42 = vrot.slane %v1156_v31, 4 }
 0x49d   :  { %v1129_v43 = vrot.slane %v1128_v32, 1  ;;  %v1160_v44 = vadd.f32 %v1159_v33, %v1158_v24  ;;  %v1141_v45 = vrot.slane %v1140_v35, 1  ;;  %v1172_v46 = vadd.f32 %v1171_v36, %v1170_v26 }
 0x49e   :  { %v1134_v47 = vadd.f32 %v1133_v37, %v1132_v27  ;;  %v1165_v48 = vrot.slane %v1164_v38, 2  ;;  %v1145_v50 = vrot.slane %v1144_v40, 2  ;;  %v1176_v51 = vadd.f32 %v1175_v42, %v1156_v31  ;;  %v1193_v42 = vld [vmem:[%s4602_s11] sm:$0xf] }
 0x49f   :  { %v1130_v52 = vadd.f32 %v1129_v43, %v1128_v32  ;;  %v1161_v54 = vrot.slane %v1160_v44, 1  ;;  %v1142_v55 = vadd.f32 %v1141_v45, %v1140_v35  ;;  %v1173_v56 = vrot.slane %v1172_v46, 1 }
 0x4a0   :  { %v1135_v49 = vrot.slane %v1134_v47, 1  ;;  %v1166_v53 = vadd.f32 %v1165_v48, %v1164_v38  ;;  %v1146_v57 = vadd.f32 %v1145_v50, %v1144_v40  ;;  %v1177_v58 = vrot.slane %v1176_v51, 2 }
 0x4a1   :  { %v1149_v59 = vmul.f32 0.125, %v1130_v52  ;;  %v1162_v60 = vadd.f32 %v1161_v54, %v1160_v44  ;;  %v1151_v61 = vmul.f32 0.125, %v1142_v55  ;;  %v1174_v62 = vadd.f32 %v1173_v56, %v1172_v46 }
 0x4a2   :  { %v1136_v63 = vadd.f32 %v1135_v49, %v1134_v47  ;;  %v1167_v0 = vrot.slane %v1166_v53, 1  ;;  %v1147_v1 = vrot.slane %v1146_v57, 1  ;;  %v1178_v2 = vadd.f32 %v1177_v58, %v1176_v51 }
 0x4a3   :  { %v1181_v5 = vmul.f32 0.125, %v1162_v60  ;;  %v1185_v6 = vmul.f32 %v1149_v59, %v1149_v59  ;;  %v1183_v7 = vmul.f32 0.125, %v1174_v62  ;;  %v1187_v8 = vmul.f32 %v1151_v61, %v1151_v61 }
 0x4a4   :  { %v1150_v9 = vmul.f32 0.125, %v1136_v63  ;;  %v1168_v10 = vadd.f32 %v1167_v0, %v1166_v53  ;;  %v1148_v11 = vadd.f32 %v1147_v1, %v1146_v57  ;;  %v1179_v12 = vrot.slane %v1178_v2, 1 }
 0x4a5   :  { %v1189_v13 = vsub.f32 %v1181_v5, %v1185_v6  ;;  %v1191_v15 = vsub.f32 %v1183_v7, %v1187_v8  ;;  %v4518_v44 = vsub.s32 2, %v4451_v39  ;;  %v4521_v45 = vsub.s32 3, %v4451_v39 }
 0x4a6   :  { %v1182_v16 = vmul.f32 0.125, %v1168_v10  ;;  %v1186_v17 = vmul.f32 %v1150_v9, %v1150_v9  ;;  %v1152_v18 = vmul.f32 0.125, %v1148_v11  ;;  %v1180_v19 = vadd.f32 %v1179_v12, %v1178_v2  ;;  %v3780_v10 = vld [vmem:[#allocation14 + $0x380] ss:$28 sps:$4 sm:$0xff]   ;;  %v3783_v11 = vld [vmem:[#allocation14 + $0x388] ss:$28 sps:$4 sm:$0xff]  }
 0x4a7   :  { %v1194_v20 = vadd.f32 0.8, %v1189_v13  ;;  %v1196_v21 = vadd.f32 0.8, %v1191_v15  ;;  %v3791_v13 = vld [vmem:[#allocation14 + $0x3c4] ss:$28 sps:$4 sm:$0xff]  }
 0x4a8   :  { %v1190_v23 = vsub.f32 %v1182_v16, %v1186_v17  ;;  %v1184_v24 = vmul.f32 0.125, %v1180_v19  ;;  %v1188_v25 = vmul.f32 %v1152_v18, %v1152_v18  ;;  %v3786_v16 = vld [vmem:[#allocation14 + $0x3b8] ss:$28 sps:$4 sm:$0xff]   ;;  %v3789_v17 = vld [vmem:[#allocation14 + $0x3c0] ss:$28 sps:$4 sm:$0xff]  }
 0x4a9   :  { %4012 = vrsqrt.f32 %v1194_v20  ;;  %v3797_v19 = vld [vmem:[#allocation14 + $0x3fc] ss:$28 sps:$4 sm:$0xff]   ;;  %v3792_v20 = vld [vmem:[#allocation14 + $0x3f0] ss:$28 sps:$4 sm:$0xff]  }
 0x4aa   :  { %v1195_v26 = vadd.f32 0.8, %v1190_v23  ;;  %v1192_v27 = vsub.f32 %v1184_v24, %v1188_v25  ;;  %4014 = vrsqrt.f32 %v1196_v21  ;;  %v3795_v21 = vld [vmem:[#allocation14 + $0x3f8] ss:$28 sps:$4 sm:$0xff]   ;;  %v3800_v23 = vld [vmem:[#allocation14 + $0x42c] ss:$28 sps:$4 sm:$0xff]  }
 0x4ab   :  { %v3803_v24 = vld [vmem:[#allocation14 + $0x434] ss:$28 sps:$4 sm:$0xff]   ;;  %v3798_v25 = vld [vmem:[#allocation14 + $0x428] ss:$28 sps:$4 sm:$0xff]  }
 0x4ac   :  { %4016 = vrsqrt.f32 %v1195_v26  ;;  %v1197_v29 = vadd.f32 0.8, %v1192_v27  ;;  %v3801_v26 = vld [vmem:[#allocation14 + $0x430] ss:$28 sps:$4 sm:$0xff]   ;;  %v3806_v27 = vld [vmem:[#allocation14 + $0x464] ss:$28 sps:$4 sm:$0xff]  }
 0x4ae   :  { %4018 = vrsqrt.f32 %v1197_v29  ;;  %v3809_v29 = vld [vmem:[#allocation14 + $0x46c] ss:$28 sps:$4 sm:$0xff]  }
 0x4b3   :  { %v4013_v30 = vpop.eup %4012 }
 0x4b4   :  { %v4015_v31 = vpop.eup %4014 }
 0x4b6   :  { %v4017_v32 = vpop.eup %4016 }
 0x4b7   :  { %v1206_v33 = vcombine.low %v4013_v30, %v4017_v32  ;;  %v3804_v30 = vld [vmem:[#allocation14 + $0x460] ss:$28 sps:$4 sm:$0xff]  }
 0x4b8   :  { %v4019_v35 = vpop.eup %4018  ;;  %v3812_v32 = vld [vmem:[#allocation14 + $0x49c] ss:$28 sps:$4 sm:$0xff]  }
 0x4b9   :  { %v1207_v36 = vcombine.low %v4015_v31, %v4019_v35  ;;  %v1214_v37 = vrot.slane %v1206_v33, %v4468_v28  ;;  %v3807_v31 = vld [vmem:[#allocation14 + $0x468] ss:$28 sps:$4 sm:$0xff]   ;;  %v3810_v35 = vld [vmem:[#allocation14 + $0x498] ss:$28 sps:$4 sm:$0xff]  }
 0x4ba   :  { %v3815_v33 = vld [vmem:[#allocation14 + $0x4a4] ss:$28 sps:$4 sm:$0xff]  }
 0x4bb   :  { %v1221_v38 = vrot.slane %v1207_v36, %v4468_v28  ;;  %v3813_v36 = vld [vmem:[#allocation14 + $0x4a0] ss:$28 sps:$4 sm:$0xff]  }
 0x4bd   :  { %v1222_v40 = vcombine.low %v1214_v37, %v1221_v38  ;;  %v3818_v37 = vld [vmem:[#allocation14 + $0x4d4] ss:$28 sps:$4 sm:$0xff]   ;;  %v3821_v38 = vld [vmem:[#allocation14 + $0x4dc] ss:$28 sps:$4 sm:$0xff]  }
 0x4bf   :  { %v1229_v43 = vrot.slane %v1222_v40, %v4468_v28  ;;  %v3816_v40 = vld [vmem:[#allocation14 + $0x4d0] ss:$28 sps:$4 sm:$0xff]  }
 0x4c1   :  { %v1231_v46 = vmul.f32 %v1229_v43, %v1193_v42  ;;  %v3819_v42 = vld [vmem:[#allocation14 + $0x4d8] ss:$28 sps:$4 sm:$0xff]   ;;  %v3824_v43 = vld [vmem:[#allocation14 + $0x50c] ss:$28 sps:$4 sm:$0xff]  }
 0x4c3   :  { %v1245_v47 = vrot.slane %v1231_v46, %v4518_v44  ;;  %v1249_v48 = vrot.slane %v1231_v46, %v4521_v45  ;;  %v1237_v50 = vrot.slane %v1231_v46, %v4454_v41  ;;  %v1241_v51 = vrot.slane %v1231_v46, %v4476_v34  ;;  %v3827_v46 = vld [vmem:[#allocation14 + $0x514] ss:$28 sps:$4 sm:$0xff]  }
 0x4c5   :  { %v1256_v52 = vmul.f32 %v1245_v47, %v1151_v61  ;;  %v1257_v54 = vmul.f32 %v1249_v48, %v1152_v18  ;;  %v1291_v55 = vmul.f32 %v1249_v48, %v4504_v22  ;;  %v1254_v56 = vmul.f32 %v1237_v50, %v1149_v59  ;;  %v1232_v61 = vld [vmem:[%s4603_s12] sm:$0xf]  ;;  %v3794_v18 = vld [vmem:[#allocation14 + $0x3f4] ss:$28 sps:$4 sm:$0xff]  }
 0x4c6   :  { %v1255_v49 = vmul.f32 %v1241_v51, %v1150_v9  ;;  %v1289_v53 = vmul.f32 %v1241_v51, %v4497_v14  ;;  %v1288_v57 = vmul.f32 %v1237_v50, %v4487_v3  ;;  %v1290_v58 = vmul.f32 %v1245_v47, %v4489_v4  ;;  %v3822_v47 = vld [vmem:[#allocation14 + $0x508] ss:$28 sps:$4 sm:$0xff]   ;;  %v3825_v48 = vld [vmem:[#allocation14 + $0x510] ss:$28 sps:$4 sm:$0xff]  }
 0x4c7   :  { %v1263_v60 = vcombine.low %v1256_v52, %v1257_v54  ;;  %v3830_v50 = vld [vmem:[#allocation14 + $0x544] ss:$28 sps:$4 sm:$0xff]   ;;  %v3833_v51 = vld [vmem:[#allocation14 + $0x54c] ss:$28 sps:$4 sm:$0xff]  }
 0x4c8   :  { %v1262_v62 = vcombine.low %v1254_v56, %v1255_v49  ;;  %v3828_v52 = vld [vmem:[#allocation14 + $0x540] ss:$28 sps:$4 sm:$0xff]   ;;  %v3831_v54 = vld [vmem:[#allocation14 + $0x548] ss:$28 sps:$4 sm:$0xff]   ;;  %v3834_v49 = vld [vmem:[#allocation14 + $0x578] ss:$28 sps:$4 sm:$0xff]  }
 0x4c9   :  { %v1277_v63 = vrot.slane %v1263_v60, %v4468_v28  ;;  %v3839_v56 = vld [vmem:[#allocation14 + $0x584] ss:$28 sps:$4 sm:$0xff]   ;;  %v3840_v60 = vld [vmem:[#allocation14 + $0x5b0] ss:$28 sps:$4 sm:$0xff]  }
 0x4ca   :  { %v1270_v0 = vrot.slane %v1262_v62, %v4468_v28  ;;  %v3843_v62 = vld [vmem:[#allocation14 + $0x5b8] ss:$28 sps:$4 sm:$0xff]  }
 0x4cc   :  { %v1278_v1 = vcombine.low %v1270_v0, %v1277_v63  ;;  %v3848_v63 = vld [vmem:[#allocation14 + $0x5ec] ss:$28 sps:$4 sm:$0xff]   ;;  %v3851_v0 = vld [vmem:[#allocation14 + $0x5f4] ss:$28 sps:$4 sm:$0xff]  }
 0x4ce   :  { %v1285_v22 = vrot.slane %v1278_v1, %v4468_v28  ;;  %v3788_v28 = vld [vmem:[#allocation14 + $0x3bc] ss:$28 sps:$4 sm:$0xff]   ;;  %v3846_v1 = vld [vmem:[#allocation14 + $0x5e8] ss:$28 sps:$4 sm:$0xff]  }
 0x4d0   :  { %v1287_v59 = vsub.f32 %v1232_v61, %v1285_v22  ;;  %v3849_v61 = vld [vmem:[#allocation14 + $0x5f0] ss:$28 sps:$4 sm:$0xff]   ;;  %v3854_v22 = vld [vmem:[#allocation14 + $0x624] ss:$28 sps:$4 sm:$0xff]  }
 0x4d2   :  { %v1300_v14 = vrot.slane %v1287_v59, %v4476_v34  ;;  %v1296_v3 = vrot.slane %v1287_v59, %v4454_v41  ;;  %v1308_v4 = vrot.slane %v1287_v59, %v4521_v45  ;;  %v1304_v2 = vrot.slane %v1287_v59, %v4518_v44  ;;  %v3857_v59 = vld [vmem:[#allocation14 + $0x62c] ss:$28 sps:$4 sm:$0xff]  }
 0x4d4   :  { %v1314_v5 = vadd.f32 %v1300_v14, %v1289_v53  ;;  %v1313_v6 = vadd.f32 %v1296_v3, %v1288_v57  ;;  %v1316_v7 = vadd.f32 %v1308_v4, %v1291_v55  ;;  %v4541_v8 = vadd.f32 %v1304_v2, %v1290_v58  ;;  %v3836_v55 = vld [vmem:[#allocation14 + $0x57c] ss:$28 sps:$4 sm:$0xff]   ;;  %v3842_v57 = vld [vmem:[#allocation14 + $0x5b4] ss:$28 sps:$4 sm:$0xff]   ;;  %v3855_v3 = vld [vmem:[#allocation14 + $0x628] ss:$28 sps:$4 sm:$0xff]  }
 0x4d5   :  { %v3837_v53 = vld [vmem:[#allocation14 + $0x580] ss:$28 sps:$4 sm:$0xff]  }
 0x4d6   :  { %v4543_v9 = vpack.c.bf16 %v1314_v5, %v1314_v5  ;;  %v4545_v12 = vpack.c.bf16 %v1313_v6, %v1313_v6  ;;  %v4551_v15 = vpack.c.bf16 %v1316_v7, %v1316_v7  ;;  %v3845_v58 = vld [vmem:[#allocation14 + $0x5bc] ss:$28 sps:$4 sm:$0xff]   ;;  %v3863_v2 = vld [vmem:[#allocation14 + $0x664] ss:$28 sps:$4 sm:$0xff]   ;;  %v3866_v7 = vld [vmem:[#allocation14 + $0x694] ss:$28 sps:$4 sm:$0xff]  }
 0x4d7   :  { %v3852_v14 = vld [vmem:[#allocation14 + $0x620] ss:$28 sps:$4 sm:$0xff]   ;;  %v3858_v5 = vld [vmem:[#allocation14 + $0x658] ss:$28 sps:$4 sm:$0xff]  }
 0x4d8   :  { %2798 = vmatprep.mubr.bf16.mxu1 %v4543_v9  ;;  %2880 = vmatprep.mubr.bf16.mxu0 %v4543_v9  ;;  %v3860_v4 = vld [vmem:[#allocation14 + $0x65c] ss:$28 sps:$4 sm:$0xff]  }
 0x4d9   :  { %2799 = vmatmul.mubr.bf16.vlgmr.msra.gmra.mrb[4].mxu1 %v4545_v12  ;;  %2881 = vmatmul.mubr.bf16.vlgmr.msra.gmra.mrb[16].mxu0 %v4545_v12  ;;  %v3861_v6 = vld [vmem:[#allocation14 + $0x660] ss:$28 sps:$4 sm:$0xff]  }
 0x4da   :  { %2808 = vmatpush1.bf16.msra.mxu1 %v3780_v10  ;;  %2890 = vmatpush1.bf16.msra.mxu0 %v3783_v11  ;;  %v3869_v10 = vld [vmem:[#allocation14 + $0x69c] ss:$28 sps:$4 sm:$0xff]   ;;  %v3864_v11 = vld [vmem:[#allocation14 + $0x690] ss:$28 sps:$4 sm:$0xff]  }
 0x4db   :  { %2839 = vmatprep.mubr.bf16.mxu1 %v4551_v15  ;;  %2921 = vmatprep.mubr.bf16.mxu0 %v4551_v15 }
 0x4dc   :  { %2809 = vmatprep.subr.bf16.mxu1 %v3788_v28  ;;  %2891 = vmatprep.subr.bf16.mxu0 %v3791_v13  ;;  %v3867_v28 = vld [vmem:[#allocation14 + $0x698] ss:$28 sps:$4 sm:$0xff]   ;;  %v3872_v13 = vld [vmem:[#allocation14 + $0x6cc] ss:$28 sps:$4 sm:$0xff]  }
 0x4de   :  { %2810 = vmatpush1.bf16.msra.mxu1 %v3786_v16  ;;  %2892 = vmatpush1.bf16.msra.mxu0 %v3789_v17  ;;  %v3875_v16 = vld [vmem:[#allocation14 + $0x6d4] ss:$28 sps:$4 sm:$0xff]   ;;  %v3870_v17 = vld [vmem:[#allocation14 + $0x6c8] ss:$28 sps:$4 sm:$0xff]  }
 0x4df   :  { %2811 = vmatprep.subr.bf16.mxu1 %v3794_v18  ;;  %2893 = vmatprep.subr.bf16.mxu0 %v3797_v19  ;;  %v3873_v18 = vld [vmem:[#allocation14 + $0x6d0] ss:$28 sps:$4 sm:$0xff]  }
 0x4e0   :  { %v3878_v19 = vld [vmem:[#allocation14 + $0x14] ss:$28 sps:$4 sm:$0xff]  }
 0x4e2   :  { %2812 = vmatpush1.bf16.msra.mxu1 %v3792_v20  ;;  %2894 = vmatpush1.bf16.msra.mxu0 %v3795_v21  ;;  %v3879_v20 = vld [vmem:[#allocation14 + $0x1d8] ss:$28 sps:$4 sm:$0xff]   ;;  %v3876_v21 = vld [vmem:[#allocation14 + $0x10] ss:$28 sps:$4 sm:$0xff]  }
 0x4e3   :  { %2813 = vmatprep.subr.bf16.mxu1 %v3800_v23  ;;  %2895 = vmatprep.subr.bf16.mxu0 %v3803_v24  ;;  %v4557_v23 = vpack.c.bf16 %v4541_v8, %v4541_v8  ;;  %v3880_v24 = vld [vmem:[#allocation14 + $0x18] ss:$28 sps:$4 sm:$0xff]   ;;  %v3889_v8 = vld [vmem:[#allocation14 + $0x248] ss:$28 sps:$4 sm:$0xff]  }
 0x4e6   :  { %2814 = vmatpush1.bf16.msra.mxu1 %v3798_v25  ;;  %2896 = vmatpush1.bf16.msra.mxu0 %v3801_v26  ;;  %v3883_v25 = vld [vmem:[#allocation14 + $0x4c] ss:$28 sps:$4 sm:$0xff]  }
 0x4e7   :  { %2815 = vmatprep.subr.bf16.mxu1 %v3806_v27  ;;  %2897 = vmatprep.subr.bf16.mxu0 %v3809_v29  ;;  %v3884_v26 = vld [vmem:[#allocation14 + $0x210] ss:$28 sps:$4 sm:$0xff]   ;;  %v3881_v27 = vld [vmem:[#allocation14 + $0x48] ss:$28 sps:$4 sm:$0xff]  }
 0x4e8   :  { %v3885_v29 = vld [vmem:[#allocation14 + $0x50] ss:$28 sps:$4 sm:$0xff]  }
 0x4ea   :  { %2816 = vmatpush1.bf16.msra.mxu1 %v3804_v30  ;;  %2898 = vmatpush1.bf16.msra.mxu0 %v3807_v31  ;;  %v3888_v30 = vld [vmem:[#allocation14 + $0x84] ss:$28 sps:$4 sm:$0xff]  }
 0x4eb   :  { %2817 = vmatprep.subr.bf16.mxu1 %v3812_v32  ;;  %2899 = vmatprep.subr.bf16.mxu0 %v3815_v33  ;;  %v3886_v31 = vld [vmem:[#allocation14 + $0x80] ss:$28 sps:$4 sm:$0xff]   ;;  %v3890_v32 = vld [vmem:[#allocation14 + $0x88] ss:$28 sps:$4 sm:$0xff]  }
 0x4ec   :  { %v3893_v33 = vld [vmem:[#allocation14 + $0xbc] ss:$28 sps:$4 sm:$0xff]  }
 0x4ee   :  { %2818 = vmatpush1.bf16.msra.mxu1 %v3810_v35  ;;  %2900 = vmatpush1.bf16.msra.mxu0 %v3813_v36  ;;  %v3894_v35 = vld [vmem:[#allocation14 + $0x280] ss:$28 sps:$4 sm:$0xff]   ;;  %v3891_v36 = vld [vmem:[#allocation14 + $0xb8] ss:$28 sps:$4 sm:$0xff]  }
 0x4ef   :  { %2819 = vmatprep.subr.bf16.mxu1 %v3818_v37  ;;  %2901 = vmatprep.subr.bf16.mxu0 %v3821_v38  ;;  %v3895_v37 = vld [vmem:[#allocation14 + $0xc0] ss:$28 sps:$4 sm:$0xff]   ;;  %v3898_v38 = vld [vmem:[#allocation14 + $0xf4] ss:$28 sps:$4 sm:$0xff]  }
 0x4f2   :  { %2820 = vmatpush1.bf16.msra.mxu1 %v3816_v40  ;;  %2902 = vmatpush1.bf16.msra.mxu0 %v3819_v42  ;;  %v3896_v40 = vld [vmem:[#allocation14 + $0xf0] ss:$28 sps:$4 sm:$0xff]   ;;  %v3900_v42 = vld [vmem:[#allocation14 + $0xf8] ss:$28 sps:$4 sm:$0xff]  }
 0x4f3   :  { %2821 = vmatprep.subr.bf16.mxu1 %v3824_v43  ;;  %2903 = vmatprep.subr.bf16.mxu0 %v3827_v46  ;;  %v3903_v43 = vld [vmem:[#allocation14 + $0x12c] ss:$28 sps:$4 sm:$0xff]  }
 0x4f4   :  { %v3904_v46 = vld [vmem:[#allocation14 + $0x2f0] ss:$28 sps:$4 sm:$0xff]  }
 0x4f6   :  { %2822 = vmatpush1.bf16.msra.mxu1 %v3822_v47  ;;  %2904 = vmatpush1.bf16.msra.mxu0 %v3825_v48  ;;  %v3901_v47 = vld [vmem:[#allocation14 + $0x128] ss:$28 sps:$4 sm:$0xff]   ;;  %v3905_v48 = vld [vmem:[#allocation14 + $0x130] ss:$28 sps:$4 sm:$0xff]  }
 0x4f7   :  { %2823 = vmatprep.subr.bf16.mxu1 %v3830_v50  ;;  %2905 = vmatprep.subr.bf16.mxu0 %v3833_v51  ;;  %v3908_v50 = vld [vmem:[#allocation14 + $0x164] ss:$28 sps:$4 sm:$0xff]  }
 0x4f8   :  { %v3909_v51 = vld [vmem:[#allocation14 + $0x328] ss:$28 sps:$4 sm:$0xff]  }
 0x4fa   :  { %2824 = vmatpush1.bf16.msra.mxu1 %v3828_v52  ;;  %2906 = vmatpush1.bf16.msra.mxu0 %v3831_v54  ;;  %v3906_v52 = vld [vmem:[#allocation14 + $0x160] ss:$28 sps:$4 sm:$0xff]   ;;  %v3910_v54 = vld [vmem:[#allocation14 + $0x168] ss:$28 sps:$4 sm:$0xff]  }
 0x4fb   :  { %2825 = vmatprep.subr.bf16.mxu1 %v3836_v55  ;;  %2907 = vmatprep.subr.bf16.mxu0 %v3839_v56  ;;  %v3913_v55 = vld [vmem:[#allocation14 + $0x19c] ss:$28 sps:$4 sm:$0xff]  }
 0x4fc   :  { %v3914_v56 = vld [vmem:[#allocation14 + $0x360] ss:$28 sps:$4 sm:$0xff]  }
 0x4fe   :  { %2826 = vmatpush1.bf16.msra.mxu1 %v3834_v49  ;;  %2908 = vmatpush1.bf16.msra.mxu0 %v3837_v53  ;;  %v3911_v49 = vld [vmem:[#allocation14 + $0x198] ss:$28 sps:$4 sm:$0xff]   ;;  %v3915_v53 = vld [vmem:[#allocation14 + $0x1a0] ss:$28 sps:$4 sm:$0xff]  }
 0x4ff   :  { %2827 = vmatprep.subr.bf16.mxu1 %v3842_v57  ;;  %2909 = vmatprep.subr.bf16.mxu0 %v3845_v58  ;;  %v3918_v57 = vld [vmem:[#allocation14 + $0x1d4] ss:$28 sps:$4 sm:$0xff]  }
 0x500   :  { %v3919_v58 = vld [vmem:[#allocation14 + $0x558] ss:$28 sps:$4 sm:$0xff]  }
 0x502   :  { %2828 = vmatpush1.bf16.msra.mxu1 %v3840_v60  ;;  %2910 = vmatpush1.bf16.msra.mxu0 %v3843_v62  ;;  %v3916_v60 = vld [vmem:[#allocation14 + $0x1d0] ss:$28 sps:$4 sm:$0xff]   ;;  %v3920_v62 = vld [vmem:[#allocation14 + $0x398] ss:$28 sps:$4 sm:$0xff]  }
 0x503   :  { %2829 = vmatprep.subr.bf16.mxu1 %v3848_v63  ;;  %2911 = vmatprep.subr.bf16.mxu0 %v3851_v0  ;;  %v3923_v63 = vld [vmem:[#allocation14 + $0x20c] ss:$28 sps:$4 sm:$0xff]  }
 0x504   :  { %v3924_v0 = vld [vmem:[#allocation14 + $0x590] ss:$28 sps:$4 sm:$0xff]  }
 0x506   :  { %2830 = vmatpush1.bf16.msra.mxu1 %v3846_v1  ;;  %2912 = vmatpush1.bf16.msra.mxu0 %v3849_v61  ;;  %v3921_v1 = vld [vmem:[#allocation14 + $0x208] ss:$28 sps:$4 sm:$0xff]   ;;  %v3925_v61 = vld [vmem:[#allocation14 + $0x3d0] ss:$28 sps:$4 sm:$0xff]  }
 0x507   :  { %2831 = vmatprep.subr.bf16.mxu1 %v3854_v22  ;;  %2913 = vmatprep.subr.bf16.mxu0 %v3857_v59  ;;  %v3928_v22 = vld [vmem:[#allocation14 + $0x244] ss:$28 sps:$4 sm:$0xff]  }
 0x508   :  { %v3929_v59 = vld [vmem:[#allocation14 + $0x5c8] ss:$28 sps:$4 sm:$0xff]  }
 0x50a   :  { %2832 = vmatpush1.bf16.msra.mxu1 %v3852_v14  ;;  %2914 = vmatpush1.bf16.msra.mxu0 %v3855_v3  ;;  %v3926_v14 = vld [vmem:[#allocation14 + $0x240] ss:$28 sps:$4 sm:$0xff]   ;;  %v3930_v3 = vld [vmem:[#allocation14 + $0x408] ss:$28 sps:$4 sm:$0xff]  }
 0x50b   :  { %2833 = vmatprep.subr.bf16.mxu1 %v3860_v4  ;;  %2915 = vmatprep.subr.bf16.mxu0 %v3863_v2  ;;  %v3933_v4 = vld [vmem:[#allocation14 + $0x27c] ss:$28 sps:$4 sm:$0xff]  }
 0x50c   :  { %v3934_v2 = vld [vmem:[#allocation14 + $0x600] ss:$28 sps:$4 sm:$0xff]  }
 0x50e   :  { %2834 = vmatpush1.bf16.msra.mxu1 %v3858_v5  ;;  %2916 = vmatpush1.bf16.msra.mxu0 %v3861_v6  ;;  %v3931_v5 = vld [vmem:[#allocation14 + $0x278] ss:$28 sps:$4 sm:$0xff]   ;;  %v3935_v6 = vld [vmem:[#allocation14 + $0x440] ss:$28 sps:$4 sm:$0xff]  }
 0x50f   :  { %2835 = vmatprep.subr.bf16.mxu1 %v3866_v7  ;;  %2917 = vmatprep.subr.bf16.mxu0 %v3869_v10  ;;  %v3938_v7 = vld [vmem:[#allocation14 + $0x2b4] ss:$28 sps:$4 sm:$0xff]  }
 0x510   :  { %v3939_v10 = vld [vmem:[#allocation14 + $0x638] ss:$28 sps:$4 sm:$0xff]  }
 0x512   :  { %2836 = vmatpush1.bf16.msra.mxu1 %v3864_v11  ;;  %2918 = vmatpush1.bf16.msra.mxu0 %v3867_v28  ;;  %v3936_v11 = vld [vmem:[#allocation14 + $0x2b0] ss:$28 sps:$4 sm:$0xff]   ;;  %v3940_v28 = vld [vmem:[#allocation14 + $0x478] ss:$28 sps:$4 sm:$0xff]  }
 0x513   :  { %2837 = vmatprep.subr.bf16.mxu1 %v3872_v13  ;;  %2919 = vmatprep.subr.bf16.mxu0 %v3875_v16  ;;  %v3943_v13 = vld [vmem:[#allocation14 + $0x2ec] ss:$28 sps:$4 sm:$0xff]  }
 0x514   :  { %v3944_v16 = vld [vmem:[#allocation14 + $0x670] ss:$28 sps:$4 sm:$0xff]  }
 0x516   :  { %2838 = vmatpush1.bf16.msra.mxu1 %v3870_v17  ;;  %2920 = vmatpush1.bf16.msra.mxu0 %v3873_v18  ;;  %v3941_v17 = vld [vmem:[#allocation14 + $0x2e8] ss:$28 sps:$4 sm:$0xff]   ;;  %v3945_v18 = vld [vmem:[#allocation14 + $0x4b0] ss:$28 sps:$4 sm:$0xff]  }
 0x517   :  { %2930 = vmatprep.subr.bf16.mxu1 %v3878_v19  ;;  %3449 = vmatprep.subr.bf16.mxu0 %v3879_v20  ;;  %v3948_v19 = vld [vmem:[#allocation14 + $0x324] ss:$28 sps:$4 sm:$0xff]  }
 0x518   :  { %v3949_v20 = vld [vmem:[#allocation14 + $0x6a8] ss:$28 sps:$4 sm:$0xff]  }
 0x519   :  { %2840 = vmatmul.mubr.bf16.vlgmr.msra.gmra.mrb[4].mxu1 %v4557_v23  ;;  %2922 = vmatmul.mubr.bf16.vlgmr.msra.gmra.mrb[16].mxu0 %v4557_v23 }
 0x51a   :  { %2931 = vmatpush1.bf16.msra.mxu1 %v3876_v21  ;;  %2962 = vmatprep.mubr.bf16.mxu1 %v4543_v9  ;;  %v3946_v21 = vld [vmem:[#allocation14 + $0x320] ss:$28 sps:$4 sm:$0xff]  }
 0x51b   :  { %3450 = vmatpush3.bf16.msra.mxu0 %v3880_v24  ;;  %3044 = vmatprep.mubr.bf16.mxu0 %v4543_v9  ;;  %v3899_v9 = vld [vmem:[#allocation14 + $0x2b8] ss:$28 sps:$4 sm:$0xff]   ;;  %v3950_v24 = vld [vmem:[#allocation14 + $0x4e8] ss:$28 sps:$4 sm:$0xff]  }
 0x51c   :  { %2932 = vmatprep.subr.bf16.mxu1 %v3883_v25  ;;  %3451 = vmatprep.subr.bf16.mxu0 %v3884_v26  ;;  %v3953_v25 = vld [vmem:[#allocation14 + $0x35c] ss:$28 sps:$4 sm:$0xff]  }
 0x51d   :  { %v3954_v26 = vld [vmem:[#allocation14 + $0x6e0] ss:$28 sps:$4 sm:$0xff]  }
 0x51e   :  { %2933 = vmatpush1.bf16.msra.mxu1 %v3881_v27  ;;  %v3951_v27 = vld [vmem:[#allocation14 + $0x358] ss:$28 sps:$4 sm:$0xff]  }
 0x51f   :  { %3452 = vmatpush3.bf16.msra.mxu0 %v3885_v29  ;;  %2934 = vmatprep.subr.bf16.mxu1 %v3888_v30  ;;  %v3955_v29 = vld [vmem:[#allocation14 + $0x520] ss:$28 sps:$4 sm:$0xff]   ;;  %v3958_v30 = vld [vmem:[#allocation14 + $0x394] ss:$28 sps:$4 sm:$0xff]  }
 0x520   :  { %3453 = vmatprep.subr.bf16.mxu0 %v3889_v8  ;;  %v3956_v8 = vld [vmem:[#allocation14 + $0x390] ss:$28 sps:$4 sm:$0xff]  }
 0x522   :  { %2935 = vmatpush1.bf16.msra.mxu1 %v3886_v31  ;;  %v3961_v31 = vld [vmem:[#allocation14 + $0x3cc] ss:$28 sps:$4 sm:$0xff]  }
 0x523   :  { %3454 = vmatpush3.bf16.msra.mxu0 %v3890_v32  ;;  %2936 = vmatprep.subr.bf16.mxu1 %v3893_v33  ;;  %v3959_v32 = vld [vmem:[#allocation14 + $0x3c8] ss:$28 sps:$4 sm:$0xff]  }
 0x524   :  { %3455 = vmatprep.subr.bf16.mxu0 %v3894_v35  ;;  %v3964_v33 = vld [vmem:[#allocation14 + $0x404] ss:$28 sps:$4 sm:$0xff]  }
 0x525   :  { %v3962_v35 = vld [vmem:[#allocation14 + $0x400] ss:$28 sps:$4 sm:$0xff]  }
 0x526   :  { %2937 = vmatpush1.bf16.msra.mxu1 %v3891_v36  ;;  %v3967_v36 = vld [vmem:[#allocation14 + $0x43c] ss:$28 sps:$4 sm:$0xff]  }
 0x527   :  { %3456 = vmatpush3.bf16.msra.mxu0 %v3895_v37  ;;  %2938 = vmatprep.subr.bf16.mxu1 %v3898_v38  ;;  %v3965_v37 = vld [vmem:[#allocation14 + $0x438] ss:$28 sps:$4 sm:$0xff]  }
 0x528   :  { %3457 = vmatprep.subr.bf16.mxu0 %v3899_v9  ;;  %v3970_v38 = vld [vmem:[#allocation14 + $0x474] ss:$28 sps:$4 sm:$0xff]  }
 0x529   :  { %v3968_v9 = vld [vmem:[#allocation14 + $0x470] ss:$28 sps:$4 sm:$0xff]  }
 0x52a   :  { %2939 = vmatpush1.bf16.msra.mxu1 %v3896_v40  ;;  %v3971_v40 = vld [vmem:[#allocation14 + $0x4a8] ss:$28 sps:$4 sm:$0xff]  }
 0x52b   :  { %3458 = vmatpush3.bf16.msra.mxu0 %v3900_v42  ;;  %2940 = vmatprep.subr.bf16.mxu1 %v3903_v43  ;;  %v3976_v42 = vld [vmem:[#allocation14 + $0x4e4] ss:$28 sps:$4 sm:$0xff]   ;;  %v3979_v43 = vld [vmem:[#allocation14 + $0x51c] ss:$28 sps:$4 sm:$0xff]  }
 0x52c   :  { %3459 = vmatprep.subr.bf16.mxu0 %v3904_v46  ;;  %v3977_v46 = vld [vmem:[#allocation14 + $0x518] ss:$28 sps:$4 sm:$0xff]  }
 0x52e   :  { %2941 = vmatpush1.bf16.msra.mxu1 %v3901_v47  ;;  %v3982_v47 = vld [vmem:[#allocation14 + $0x554] ss:$28 sps:$4 sm:$0xff]  }
 0x52f   :  { %3460 = vmatpush3.bf16.msra.mxu0 %v3905_v48  ;;  %2942 = vmatprep.subr.bf16.mxu1 %v3908_v50  ;;  %v3980_v48 = vld [vmem:[#allocation14 + $0x550] ss:$28 sps:$4 sm:$0xff]  }
 0x530   :  { %3461 = vmatprep.subr.bf16.mxu0 %v3909_v51  ;;  %v3985_v50 = vld [vmem:[#allocation14 + $0x58c] ss:$28 sps:$4 sm:$0xff]  }
 0x531   :  { %v3983_v51 = vld [vmem:[#allocation14 + $0x588] ss:$28 sps:$4 sm:$0xff]  }
 0x532   :  { %2943 = vmatpush1.bf16.msra.mxu1 %v3906_v52  ;;  %v3988_v52 = vld [vmem:[#allocation14 + $0x5c4] ss:$28 sps:$4 sm:$0xff]  }
 0x533   :  { %3462 = vmatpush3.bf16.msra.mxu0 %v3910_v54  ;;  %2944 = vmatprep.subr.bf16.mxu1 %v3913_v55  ;;  %v3986_v54 = vld [vmem:[#allocation14 + $0x5c0] ss:$28 sps:$4 sm:$0xff]  }
 0x534   :  { %3463 = vmatprep.subr.bf16.mxu0 %v3914_v56  ;;  %v3991_v55 = vld [vmem:[#allocation14 + $0x5fc] ss:$28 sps:$4 sm:$0xff]  }
 0x535   :  { %v3989_v56 = vld [vmem:[#allocation14 + $0x5f8] ss:$28 sps:$4 sm:$0xff]  }
 0x536   :  { %2945 = vmatpush1.bf16.msra.mxu1 %v3911_v49  ;;  %v3994_v49 = vld [vmem:[#allocation14 + $0x634] ss:$28 sps:$4 sm:$0xff]  }
 0x537   :  { %3464 = vmatpush3.bf16.msra.mxu0 %v3915_v53  ;;  %2946 = vmatprep.subr.bf16.mxu1 %v3918_v57  ;;  %v3992_v53 = vld [vmem:[#allocation14 + $0x630] ss:$28 sps:$4 sm:$0xff]  }
 0x538   :  { %3471 = vmatprep.subr.bf16.mxu0 %v3919_v58  ;;  %v3997_v57 = vld [vmem:[#allocation14 + $0x66c] ss:$28 sps:$4 sm:$0xff]  }
 0x539   :  { %v3995_v58 = vld [vmem:[#allocation14 + $0x668] ss:$28 sps:$4 sm:$0xff]  }
 0x53a   :  { %3045 = vmatmul.mubr.bf16.vlgmr.msra.gmra.mrb[20].mxu0 %v4545_v12  ;;  %2947 = vmatpush1.bf16.msra.mxu1 %v3916_v60  ;;  %v4000_v60 = vld [vmem:[#allocation14 + $0x6a4] ss:$28 sps:$4 sm:$0xff]  }
 0x53b   :  { %3472 = vmatpush3.bf16.msra.mxu0 %v3920_v62  ;;  %3084 = vmatprep.mubr.bf16.mxu0 %v4551_v15  ;;  %v3998_v62 = vld [vmem:[#allocation14 + $0x6a0] ss:$28 sps:$4 sm:$0xff]  }
 0x53c   :  { %2948 = vmatprep.subr.bf16.mxu1 %v3923_v63  ;;  %3473 = vmatprep.subr.bf16.mxu0 %v3924_v0  ;;  %v4003_v63 = vld [vmem:[#allocation14 + $0x6dc] ss:$28 sps:$4 sm:$0xff]  }
 0x53d   :  { %v4001_v0 = vld [vmem:[#allocation14 + $0x6d8] ss:$28 sps:$4 sm:$0xff]  }
 0x53e   :  { %2949 = vmatpush1.bf16.msra.mxu1 %v3921_v1  ;;  %v1577_v1 = vld [vmem:[%s4605_s14] sm:$0xff]  ;;  %s4264_s14 = smov [#allocation16]  }
 0x53f   :  { %3474 = vmatpush3.bf16.msra.mxu0 %v3925_v61  ;;  %2950 = vmatprep.subr.bf16.mxu1 %v3928_v22  ;;  %v1582_v61 = vrot.slane %v1577_v1, %v4454_v41  ;;  %v1590_v22 = vrot.slane %v1577_v1, %v4518_v44  ;;  %s3112_s29 = sshll.u32 %s4264_s14, 4  ;;  %s3113_s29 = int_to_ptr.vmem [resolvable:$true] %s3112_s29 }
 0x540   :  { %3475 = vmatprep.subr.bf16.mxu0 %v3929_v59  ;;  %v1586_v59 = vrot.slane %v1577_v1, %v4476_v34  ;;  %s4210_s25 = scalar_lea.vmem %s3113_s29, 896  ;;  %p4215_p9 = scmp.lt.s32.totalorder %s3113_s29, %s3113_s29 }
 0x541   :  { %p4211_p8 = scmp.ne.s32.totalorder %s3113_s29, %s4210_s25  ;;  %p4216_p10 = scmp.lt.s32.totalorder %s4210_s25, %s4210_s25 }
 0x542   :  { %2951 = vmatpush1.bf16.msra.mxu1 %v3926_v14  ;;  %v1594_v14 = vrot.slane %v1577_v1, %v4521_v45 }
 0x543   :  { %3476 = vmatpush3.bf16.msra.mxu0 %v3930_v3  ;;  %2952 = vmatprep.subr.bf16.mxu1 %v3933_v4  ;;  %p4217_p11 = por %p4216_p10, %p4215_p9 }
 0x544   :  { %3477 = vmatprep.subr.bf16.mxu0 %v3934_v2 }
 0x545   :  { %p4218_p12 = pnand %p4217_p11, %p4211_p8 }
 0x546   :  { %2953 = vmatpush1.bf16.msra.mxu1 %v3931_v5 }
 0x547   :  { %3478 = vmatpush3.bf16.msra.mxu0 %v3935_v6  ;;  %2954 = vmatprep.subr.bf16.mxu1 %v3938_v7 }
 0x548   :  { %3479 = vmatprep.subr.bf16.mxu0 %v3939_v10 }
 0x54a   :  { %2955 = vmatpush1.bf16.msra.mxu1 %v3936_v11 }
 0x54b   :  { %3480 = vmatpush3.bf16.msra.mxu0 %v3940_v28  ;;  %2956 = vmatprep.subr.bf16.mxu1 %v3943_v13 }
 0x54c   :  { %3481 = vmatprep.subr.bf16.mxu0 %v3944_v16 }
 0x54e   :  { %2957 = vmatpush1.bf16.msra.mxu1 %v3941_v17 }
 0x54f   :  { %3482 = vmatpush3.bf16.msra.mxu0 %v3945_v18  ;;  %2958 = vmatprep.subr.bf16.mxu1 %v3948_v19 }
 0x550   :  { %3483 = vmatprep.subr.bf16.mxu0 %v3949_v20 }
 0x552   :  { %2959 = vmatpush1.bf16.msra.mxu1 %v3946_v21 }
 0x553   :  { %3484 = vmatpush3.bf16.msra.mxu0 %v3950_v24  ;;  %2960 = vmatprep.subr.bf16.mxu1 %v3953_v25  ;;  %v1605_v24 = vsub.s32 6, %v4451_v39 }
 0x554   :  { %3485 = vmatprep.subr.bf16.mxu0 %v3954_v26 }
 0x555   :  { %v1606_v25 = vrot.slane %v1577_v1, %v1605_v24 }
 0x556   :  { %2961 = vmatpush1.bf16.msra.mxu1 %v3951_v27 }
 0x557   :  { %3486 = vmatpush3.bf16.msra.mxu0 %v3955_v29  ;;  %2971 = vmatprep.subr.bf16.mxu1 %v3958_v30 }
 0x559   :  { %2963 = vmatmul.mubr.bf16.vlgmr.msra.gmra.mrb[8].mxu1 %v4545_v12  ;;  %v3973_v12 = vld [vmem:[#allocation14 + $0x4ac] ss:$28 sps:$4 sm:$0xff]  }
 0x55a   :  { %3085 = vmatmul.mubr.bf16.vlgmr.msra.gmra.mrb[24].mxu0 %v4557_v23  ;;  %2972 = vmatpush1.bf16.msra.mxu1 %v3956_v8 }
 0x55b   :  { %3003 = vmatprep.mubr.bf16.mxu1 %v4551_v15  ;;  %2973 = vmatprep.subr.bf16.mxu1 %v3961_v31  ;;  %v3974_v15 = vld [vmem:[#allocation14 + $0x4e0] ss:$28 sps:$4 sm:$0xff]  }
 0x55e   :  { %2974 = vmatpush1.bf16.msra.mxu1 %v3959_v32 }
 0x55f   :  { %2975 = vmatprep.subr.bf16.mxu1 %v3964_v33 }
 0x562   :  { %2976 = vmatpush1.bf16.msra.mxu1 %v3962_v35  ;;  %v1597_v35 = vsub.s32 4, %v4451_v39 }
 0x563   :  { %2977 = vmatprep.subr.bf16.mxu1 %v3967_v36  ;;  %v1601_v36 = vsub.s32 5, %v4451_v39 }
 0x566   :  { %2978 = vmatpush1.bf16.msra.mxu1 %v3965_v37  ;;  %v1598_v37 = vrot.slane %v1577_v1, %v1597_v35 }
 0x567   :  { %2979 = vmatprep.subr.bf16.mxu1 %v3970_v38  ;;  %v1602_v38 = vrot.slane %v1577_v1, %v1601_v36 }
 0x56a   :  { %2980 = vmatpush1.bf16.msra.mxu1 %v3968_v9 }
 0x56b   :  { %2981 = vmatprep.subr.bf16.mxu1 %v3973_v12 }
 0x56e   :  { %2982 = vmatpush1.bf16.msra.mxu1 %v3971_v40 }
 0x56f   :  { %2983 = vmatprep.subr.bf16.mxu1 %v3976_v42 }
 0x572   :  { %2984 = vmatpush1.bf16.msra.mxu1 %v3974_v15 }
 0x573   :  { %2985 = vmatprep.subr.bf16.mxu1 %v3979_v43 }
 0x576   :  { %2986 = vmatpush1.bf16.msra.mxu1 %v3977_v46 }
 0x577   :  { %2987 = vmatprep.subr.bf16.mxu1 %v3982_v47 }
 0x57a   :  { %2988 = vmatpush1.bf16.msra.mxu1 %v3980_v48 }
 0x57b   :  { %2989 = vmatprep.subr.bf16.mxu1 %v3985_v50 }
 0x57e   :  { %2990 = vmatpush1.bf16.msra.mxu1 %v3983_v51 }
 0x57f   :  { %2991 = vmatprep.subr.bf16.mxu1 %v3988_v52 }
 0x582   :  { %2992 = vmatpush1.bf16.msra.mxu1 %v3986_v54 }
 0x583   :  { %2993 = vmatprep.subr.bf16.mxu1 %v3991_v55 }
 0x586   :  { %2994 = vmatpush1.bf16.msra.mxu1 %v3989_v56 }
 0x587   :  { %2995 = vmatprep.subr.bf16.mxu1 %v3994_v49 }
 0x58a   :  { %2996 = vmatpush1.bf16.msra.mxu1 %v3992_v53 }
 0x58b   :  { %2997 = vmatprep.subr.bf16.mxu1 %v3997_v57 }
 0x58e   :  { %2998 = vmatpush1.bf16.msra.mxu1 %v3995_v58 }
 0x58f   :  { %2999 = vmatprep.subr.bf16.mxu1 %v4000_v60 }
 0x592   :  { %3000 = vmatpush1.bf16.msra.mxu1 %v3998_v62 }
 0x593   :  { %3001 = vmatprep.subr.bf16.mxu1 %v4003_v63 }
 0x596   :  { %3002 = vmatpush1.bf16.msra.mxu1 %v4001_v0 }
 0x599   :  { %3004 = vmatmul.mubr.bf16.vlgmr.msra.gmra.mrb[8].mxu1 %v4557_v23 }
 0x5ec   :  { %v2841_v3 = vpop.f32.mrb[4].mxu1  ;;  %v2923_v4 = vpop.f32.mrb[16].mxu0 }
 0x5ed   :  { %v3517_v2 = vadd.f32 %v2841_v3, %v1582_v61  ;;  %v3519_v5 = vadd.f32 %v2923_v4, %v1590_v22  ;;  %v2843_v6 = vpop.f32.mrb[5].mxu1  ;;  %v2925_v7 = vpop.f32.mrb[17].mxu0 }
 0x5ee   :  { %v3518_v10 = vadd.f32 %v2843_v6, %v1586_v59  ;;  %v3520_v23 = vadd.f32 %v2925_v7, %v1594_v14  ;;  %v2845_v11 = vpop.f32.mrb[6].mxu1  ;;  %v2927_v28 = vpop.f32.mrb[18].mxu0 }
 0x5ef   :  { %4020 = vtanh.f32 %v3517_v2  ;;  %v2846_v13 = vpop.f32.mrb[7].mxu1  ;;  %v2928_v16 = vpop.f32.mrb[19].mxu0 }
 0x5f0   :  { %4022 = vtanh.f32 %v3519_v5 }
 0x5f1   :  { %4024 = vtanh.f32 %v3518_v10 }
 0x5f2   :  { %4026 = vtanh.f32 %v3520_v23 }
 0x5f9   :  { %v4021_v41 = vpop.eup %4020 }
 0x5fa   :  { %v4023_v34 = vpop.eup %4022  ;;  %3099 = vst [vmem:[#allocation16] sm:$0xff] %v4021_v41 }
 0x5fb   :  { %v4025_v44 = vpop.eup %4024  ;;  %3101 = vst [vmem:[#allocation16 + $0x10] sm:$0xff] %v4023_v34 }
 0x5fc   :  { %v4027_v45 = vpop.eup %4026  ;;  %3100 = vst [vmem:[#allocation16 + $0x8] sm:$0xff] %v4025_v44 }
 0x5fd   :  { %3102 = vst [vmem:[#allocation16 + $0x18] sm:$0xff] %v4027_v45 }
 0x60d   :  { %v3465_v17 = vpop.f32.mrb[20].mxu0 }
 0x60e   :  { %v3466_v18 = vpop.f32.mrb[21].mxu0 }
 0x60f   :  { %v3467_v19 = vadd.f32 %v3466_v18, %v3465_v17  ;;  %v3468_v20 = vpop.f32.mrb[22].mxu0 }
 0x610   :  { %v3469_v21 = vpop.f32.mrb[23].mxu0 }
 0x611   :  { %v3047_v29 = vadd.f32 %v3467_v19, %v1606_v25 }
 0x62d   :  { %v3487_v26 = vpop.f32.mrb[24].mxu0 }
 0x62e   :  { %v3488_v27 = vpop.f32.mrb[25].mxu0 }
 0x62f   :  { %v3489_v30 = vadd.f32 %v3488_v27, %v3487_v26  ;;  %v3490_v8 = vpop.f32.mrb[26].mxu0 }
 0x630   :  { %v3491_v31 = vpop.f32.mrb[27].mxu0 }
 0x631   :  { %v3087_v32 = vadd.f32 %v3489_v30, %v3047_v29 }
 0x633   :  { %4028 = vtanh.f32 %v3087_v32 }
 0x63d   :  { %v4029_v33 = vpop.eup %4028 }
 0x63e   :  { %3105 = vst [vmem:[#allocation16 + $0x30] sm:$0xff] %v4029_v33 }
 0x66c   :  { %v3005_v9 = vpop.f32.mrb[8].mxu1 }
 0x66d   :  { %v3521_v12 = vadd.f32 %v3005_v9, %v1598_v37  ;;  %v3007_v40 = vpop.f32.mrb[9].mxu1 }
 0x66e   :  { %v3522_v42 = vadd.f32 %v3007_v40, %v1602_v38  ;;  %v3009_v15 = vpop.f32.mrb[10].mxu1 }
 0x66f   :  { %4030 = vtanh.f32 %v3521_v12  ;;  %v3010_v43 = vpop.f32.mrb[11].mxu1 }
 0x670   :  { %4032 = vtanh.f32 %v3522_v42 }
 0x679   :  { %v4031_v46 = vpop.eup %4030 }
 0x67a   :  { %v4033_v47 = vpop.eup %4032  ;;  %3103 = vst [vmem:[#allocation16 + $0x20] sm:$0xff] %v4031_v46 }
 0x67b   :  { %3104 = vst [vmem:[#allocation16 + $0x28] sm:$0xff] %v4033_v47 }
 0x67c   :  { %4221 = shalt.err (!%p4218_p12)
}
 0x67d   :  { %s4609_s27 = sld [smem:[#allocation23_spill]] }
 0x683   :  { %s4222_s1 = scalar_lea.hbm %s4609_s27, 896 }
 0x684   :  { %p4223_p13 = scmp.ne.s32.totalorder %s4609_s27, %s4222_s1  ;;  %p4226_p0 = scmp.lt.u32.totalorder %s4222_s1, %s4609_s27 }
 0x686   :  { %p4228_p1 = pnand %p4226_p0, %p4223_p13 }
 0x688   :  { %4231 = shalt.err (!%p4228_p1)
}
 0x689   :  { %3115 = dma.vmem_to_hbm [thread:$0]  %s3113_s29, 896, %s4609_s27, [#allocation4]  }
 0x68a   :  { %4242 = dma.done.wait [#allocation4], 896  }
 0x68b   :  { %4243 = vsyncadd [#allocation4], 4294966400 }
 0x68c   :  { %3119 = vsyncpa [#allocation3], 1 }
 0x68d   :  { %3120 = vsyncpa [#allocation6], 1 }
 0x68e   :  { %3121 = vsyncpa [#allocation9], 1 }
 0x68f   :  { %3122 = vsyncpa [#allocation12], 1 }
 0x690   :  { %3123 = vsyncpa [#allocation15], 1 }
 0x691   :  { %3124 = vsyncpa [#allocation4], 1 }

</bundles_post_ra>
